<compile_context>
chip_gen: v7x
topology: tpu7x:2x2x1
jax: 0.10.0
libtpu: 0.0.40
codegen_flags: <defaults>
</compile_context>

<pallas_src>
import functools

import jax
import jax.numpy as jnp
from jax import lax
from jax.experimental import pallas as pl
from jax.experimental.pallas import tpu as pltpu

# ---- module hyper-parameters (defaults of the PyTorch module, small shapes) ----
BATCH = 2
STATE_DIM = 4
ACTION_DIM = 2           # action_size
HORIZON = 8              # prediction_horizon (small, sublane-friendly)
NUM_STEPS = 40           # num_optimization_step
LR = 0.01
STD = 0.3
ACTION_REG = 0.1         # weight of the quadratic action penalty in the synthetic cost


# ----------------------------- Pallas kernel -----------------------------------
def _mpc_kernel(consts_ref, z_ref, z_out_ref, loss_ref, *,
                horizon, lr, num_steps, action_reg):
    """Single program: the whole GD loop for the whole batch, one vreg slab.

    Works in the eigenbasis of M = B @ B^T (M = Q diag(lam) Q^T, done in wrapper):
        z[h, b*A+a]  = (action @ Q)[b, h, a]        slab layout (H, B*A)
        lam, c       = eigenvalues / target @ B^T @ Q, replicated over sublanes
        grad_z       = reg*z + g - row0 * sum_h(g),  g = (z - z0)*lam - c
    z0 (operating point row) and slam = (sum_h z)*lr*lam are carried analytically so
    every iteration is pure same-shape elementwise VPU work (no XLU on the chain).
    """
    lam = consts_ref[0]        # (H, BA) eigenvalues, replicated over sublanes
    c = consts_ref[1]          # (H, BA) linear term, replicated
    s = consts_ref[2]          # (H, BA) sum_h z_init, replicated
    z0 = consts_ref[3]         # (H, BA) z_init[0], replicated
    z = z_ref[...]             # (H, BA)

    h, ba = z.shape
    row0 = lax.broadcasted_iota(jnp.int32, (h, ba), 0) == 0   # full-shape row-0 mask

    # loop-invariant, lr-pre-scaled constants (one-time elementwise work)
    decay = 1.0 - lr * action_reg        # sum_h grad == reg * sum_h z  =>  s *= decay
    lam_lr = lr * lam
    c_lr = lr * c
    hlam_lr = float(horizon) * lam_lr
    hc_lr = float(horizon) * c_lr
    slam = s * lam_lr                    # carried in place of s (saves a mul/iter)

    def gd_step(z, z0, slam):
        # lr * sum_h g   (no reduction: reconstructed from the analytic carry)
        gsum_lr = slam - z0 * hlam_lr - hc_lr
        # rows h != 0:  z - lr*(reg*z + (z - z0)*lam - c)
        z_gen = decay * z - (z - z0) * lam_lr + c_lr
        # row 0:        z0 - lr*(reg*z0 - c - gsum)
        z0_new = decay * z0 + c_lr + gsum_lr
        z_new = jnp.where(row0, z0_new, z_gen)     # keeps z[0] == z0 bitwise
        return z_new, z0_new, decay * slam

    # --- num_steps-1 gradient-only updates, fully unrolled straight-line code ---
    # (the reference recomputes the loss every step, but only the one evaluated
    #  before the final update is observable -> the other evaluations are dead work)
    for _ in range(num_steps - 1):
        z, z0, slam = gd_step(z, z0, slam)

    # --- loss at the action *before* the final update (reference semantics) ---
    # 0.5*||pred - target||^2 + 0.5*reg*||action||^2 expanded in the eigenbasis;
    # the loop-invariant 0.5*H*||target||^2 term is added in the wrapper.
    dz = z - z0                                              # row 0 is exactly zero
    loss_elem = dz * (0.5 * dz * lam - c) + (0.5 * action_reg) * (z * z)
    loss = jnp.sum(loss_elem, axis=(0, 1), keepdims=True)    # (1, 1), one-time XLU

    # --- final (num_steps-th) update ---
    z, _, _ = gd_step(z, z0, slam)

    z_out_ref[...] = z
    loss_ref[...] = loss


# ----------------------- closed-form 2x2 symmetric eigh --------------------------
def _sym_eig_2x2(gram):
    """gram = Q @ diag(lam) @ Q^T for a symmetric 2x2 matrix, pure elementwise."""
    a = gram[0, 0]
    b = gram[0, 1]
    d = gram[1, 1]
    r = jnp.sqrt((a - d) * (a - d) + 4.0 * b * b)
    theta = 0.5 * jnp.arctan2(2.0 * b, a - d)        # atan2(0,0) = 0 -> Q = I
    ct = jnp.cos(theta)
    st = jnp.sin(theta)
    lam = jnp.stack([0.5 * (a + d + r), 0.5 * (a + d - r)])
    q = jnp.stack([jnp.stack([ct, -st]), jnp.stack([st, ct])])   # columns = eigvecs
    return lam, q


# ----------------------------- wrapper ------------------------------------------
@functools.partial(jax.jit, static_argnames=("lr", "num_steps", "action_reg"))
def mpc_pallas(current_state, target_state, action_initial, b_matrix,
               *, lr=LR, num_steps=NUM_STEPS, action_reg=ACTION_REG):
    # current_state is unused in the literal forward semantics (delta_state == 0);
    # kept in the signature for interface fidelity.
    del current_state
    batch, horizon, act_dim = action_initial.shape
    ba = batch * act_dim
    hi = lax.Precision.HIGHEST

    target_state = target_state.astype(jnp.float32)
    action_initial = action_initial.astype(jnp.float32)
    b_matrix = b_matrix.astype(jnp.float32)

    # ---- one-time derived quantities (fused into the same jitted executable) ----
    gram = jnp.matmul(b_matrix, b_matrix.T, precision=hi)         # (A, A) symmetric PSD
    if act_dim == 2:
        lam, q = _sym_eig_2x2(gram)                               # closed form, no eigh
    else:
        lam, q = jnp.linalg.eigh(gram)                            # fallback (unused here)

    z_init = jnp.matmul(action_initial, q, precision=hi)          # (B, H, A)
    c = jnp.matmul(jnp.matmul(target_state, b_matrix.T, precision=hi), q,
                   precision=hi)                                  # (B, A)

    # slab layout: horizon on sublanes, batch*action interleaved on lanes
    z_slab = z_init.transpose(1, 0, 2).reshape(horizon, ba)       # (H, B*A)
    lam_lane = jnp.tile(lam, batch)                               # lane = b*A + a
    c_lane = c.reshape(ba)
    s_lane = jnp.sum(z_slab, axis=0)                              # sum_h z_init
    z0_lane = z_slab[0]                                           # operating point
    consts = jnp.broadcast_to(
        jnp.stack([lam_lane, c_lane, s_lane, z0_lane])[:, None, :],
        (4, horizon, ba))                                         # pre-replicated rows

    # loop-invariant target term of the loss (kept out of the kernel entirely)
    loss_const = 0.5 * horizon * jnp.sum(target_state * target_state)

    kernel = functools.partial(_mpc_kernel, horizon=horizon, lr=lr,
                               num_steps=num_steps, action_reg=action_reg)

    z_out, loss_kern = pl.pallas_call(
        kernel,
        out_shape=(
            jax.ShapeDtypeStruct((horizon, ba), jnp.float32),
            jax.ShapeDtypeStruct((1, 1), jnp.float32),
        ),
        grid_spec=pltpu.PrefetchScalarGridSpec(
            num_scalar_prefetch=0,
            grid=(1,),     # single program: whole problem is < 1 KiB, one vreg slab
            in_specs=[
                pl.BlockSpec((4, horizon, ba), lambda i: (0, 0, 0)),  # packed constants
                pl.BlockSpec((horizon, ba), lambda i: (0, 0)),        # z init slab
            ],
            out_specs=[
                pl.BlockSpec((horizon, ba), lambda i: (0, 0)),        # z out slab
                pl.BlockSpec((1, 1), lambda i: (0, 0)),               # scalar loss
            ],
        ),
        compiler_params=pltpu.CompilerParams(dimension_semantics=("arbitrary",)),
    )(consts, z_slab)

    # back to the original (B, H, A) action basis; loss is a single scalar
    action_out = jnp.matmul(
        z_out.reshape(horizon, batch, act_dim).transpose(1, 0, 2), q.T, precision=hi)
    loss = loss_kern[0, 0] + loss_const
    return action_out, loss


# ------------------------- pure-JAX reference (for checking) --------------------
@functools.partial(jax.jit, static_argnames=("lr", "num_steps", "action_reg"))
def mpc_reference(target_state, action_initial, b_matrix,
                  *, lr=LR, num_steps=NUM_STEPS, action_reg=ACTION_REG):
    def loss_fn(action):
        da = action - action[:, 0:1, :]
        pred = jnp.einsum("bha,as->bhs", da, b_matrix,
                          precision=lax.Precision.HIGHEST)
        err = pred - target_state[:, None, :]
        return 0.5 * jnp.sum(err * err) + 0.5 * action_reg * jnp.sum(action * action)

    action = action_initial.astype(jnp.float32)
    loss = jnp.zeros((), jnp.float32)
    for _ in range(num_steps):
        loss = loss_fn(action)
        grad = jax.grad(loss_fn)(action)
        action = action - lr * grad
    return action, loss


# ----------------------------------- main ----------------------------------------
if __name__ == "__main__":
    key = jax.random.PRNGKey(0)
    k1, k2, k3, k4 = jax.random.split(key, 4)

    current_state = jax.random.normal(k1, (BATCH, STATE_DIM), dtype=jnp.float32)
    target_state = jax.random.normal(k2, (BATCH, STATE_DIM), dtype=jnp.float32)
    # _reset with action_initial=None: randn * std (deterministic here via PRNGKey)
    action_initial = jax.random.normal(
        k3, (BATCH, HORIZON, ACTION_DIM), dtype=jnp.float32) * STD
    # synthetic stand-in for the GymEnvironmentLinearizer B matrix
    b_matrix = jax.random.normal(k4, (ACTION_DIM, STATE_DIM), dtype=jnp.float32) * 0.5

    action_out, loss_out = mpc_pallas(current_state, target_state,
                                      action_initial, b_matrix)
    jax.block_until_ready((action_out, loss_out))

    action_ref, loss_ref_val = mpc_reference(target_state, action_initial, b_matrix)
    assert bool(jnp.allclose(action_out, action_ref, atol=1e-3, rtol=1e-3)), \
        "action mismatch vs pure-JAX reference"
    assert abs(float(loss_out) - float(loss_ref_val)) < 1e-3 * max(1.0, abs(float(loss_ref_val))), \
        "loss mismatch vs pure-JAX reference"

    print("KERNEL_OK")
</pallas_src>

<mosaic_0001>
module attributes {stable_mosaic.version = 11 : i64} {
  func.func @_mpc_kernel(%arg0: i32, %arg1: memref<4x8x4xf32, #tpu.memory_space<vmem>>, %arg2: memref<8x4xf32, #tpu.memory_space<vmem>>, %arg3: memref<8x4xf32, #tpu.memory_space<vmem>>, %arg4: memref<1x1xf32, #tpu.memory_space<vmem>>) attributes {dimension_semantics = [#tpu.dimension_semantics<arbitrary>], iteration_bounds = array<i64: 1>, scalar_prefetch = 0 : i64, scratch_operands = 0 : i64, tpu.core_type = #tpu.core_type<tc>, window_params = [{pipeline_mode = #tpu.pipeline_mode<synchronous>, transform_indices = @transform_0, window_bounds = array<i64: 4, 8, 4>}, {pipeline_mode = #tpu.pipeline_mode<synchronous>, transform_indices = @transform_1, window_bounds = array<i64: 8, 4>}, {pipeline_mode = #tpu.pipeline_mode<synchronous>, transform_indices = @transform_2, window_bounds = array<i64: 8, 4>}, {pipeline_mode = #tpu.pipeline_mode<synchronous>, transform_indices = @transform_3, window_bounds = array<i64: 1, 1>}]} {
    %c0 = arith.constant 0 : index
    %c0_0 = arith.constant 0 : index
    %c0_1 = arith.constant 0 : index
    %0 = vector.load %arg1[%c0, %c0_0, %c0_1] : memref<4x8x4xf32, #tpu.memory_space<vmem>>, vector<1x8x4xf32>
    %1 = vector.shape_cast %0 : vector<1x8x4xf32> to vector<8x4xf32>
    %c1 = arith.constant 1 : index
    %c0_2 = arith.constant 0 : index
    %c0_3 = arith.constant 0 : index
    %2 = vector.load %arg1[%c1, %c0_2, %c0_3] : memref<4x8x4xf32, #tpu.memory_space<vmem>>, vector<1x8x4xf32>
    %3 = vector.shape_cast %2 : vector<1x8x4xf32> to vector<8x4xf32>
    %c2 = arith.constant 2 : index
    %c0_4 = arith.constant 0 : index
    %c0_5 = arith.constant 0 : index
    %4 = vector.load %arg1[%c2, %c0_4, %c0_5] : memref<4x8x4xf32, #tpu.memory_space<vmem>>, vector<1x8x4xf32>
    %5 = vector.shape_cast %4 : vector<1x8x4xf32> to vector<8x4xf32>
    %c3 = arith.constant 3 : index
    %c0_6 = arith.constant 0 : index
    %c0_7 = arith.constant 0 : index
    %6 = vector.load %arg1[%c3, %c0_6, %c0_7] : memref<4x8x4xf32, #tpu.memory_space<vmem>>, vector<1x8x4xf32>
    %7 = vector.shape_cast %6 : vector<1x8x4xf32> to vector<8x4xf32>
    %c0_8 = arith.constant 0 : index
    %c0_9 = arith.constant 0 : index
    %8 = vector.load %arg2[%c0_8, %c0_9] : memref<8x4xf32, #tpu.memory_space<vmem>>, vector<8x4xf32>
    %9 = tpu.iota {dimensions = array<i32: 0>} : vector<8x4xi32>
    %c0_i32 = arith.constant 0 : i32
    %10 = vector.broadcast %c0_i32 : i32 to vector<8x4xi32>
    %11 = arith.cmpi eq, %9, %10 : vector<8x4xi32>
    %cst = arith.constant 0.00999999977 : f32
    %12 = vector.broadcast %cst : f32 to vector<8x4xf32>
    %13 = arith.mulf %12, %1 : vector<8x4xf32>
    %cst_10 = arith.constant 0.00999999977 : f32
    %14 = vector.broadcast %cst_10 : f32 to vector<8x4xf32>
    %15 = arith.mulf %14, %3 : vector<8x4xf32>
    %cst_11 = arith.constant 8.000000e+00 : f32
    %16 = vector.broadcast %cst_11 : f32 to vector<8x4xf32>
    %17 = arith.mulf %16, %13 : vector<8x4xf32>
    %cst_12 = arith.constant 8.000000e+00 : f32
    %18 = vector.broadcast %cst_12 : f32 to vector<8x4xf32>
    %19 = arith.mulf %18, %15 : vector<8x4xf32>
    %20 = arith.mulf %5, %13 : vector<8x4xf32>
    %21 = arith.mulf %7, %17 : vector<8x4xf32>
    %22 = arith.subf %20, %21 : vector<8x4xf32>
    %23 = arith.subf %22, %19 : vector<8x4xf32>
    %cst_13 = arith.constant 9.990000e-01 : f32
    %24 = vector.broadcast %cst_13 : f32 to vector<8x4xf32>
    %25 = arith.mulf %24, %8 : vector<8x4xf32>
    %26 = arith.subf %8, %7 : vector<8x4xf32>
    %27 = arith.mulf %26, %13 : vector<8x4xf32>
    %28 = arith.subf %25, %27 : vector<8x4xf32>
    %29 = arith.addf %28, %15 : vector<8x4xf32>
    %cst_14 = arith.constant 9.990000e-01 : f32
    %30 = vector.broadcast %cst_14 : f32 to vector<8x4xf32>
    %31 = arith.mulf %30, %7 : vector<8x4xf32>
    %32 = arith.addf %31, %15 : vector<8x4xf32>
    %33 = arith.addf %32, %23 : vector<8x4xf32>
    %34 = arith.select %11, %33, %29 : vector<8x4xi1>, vector<8x4xf32>
    %cst_15 = arith.constant 9.990000e-01 : f32
    %35 = vector.broadcast %cst_15 : f32 to vector<8x4xf32>
    %36 = arith.mulf %35, %20 : vector<8x4xf32>
    %37 = arith.mulf %33, %17 : vector<8x4xf32>
    %38 = arith.subf %36, %37 : vector<8x4xf32>
    %39 = arith.subf %38, %19 : vector<8x4xf32>
    %cst_16 = arith.constant 9.990000e-01 : f32
    %40 = vector.broadcast %cst_16 : f32 to vector<8x4xf32>
    %41 = arith.mulf %40, %34 : vector<8x4xf32>
    %42 = arith.subf %34, %33 : vector<8x4xf32>
    %43 = arith.mulf %42, %13 : vector<8x4xf32>
    %44 = arith.subf %41, %43 : vector<8x4xf32>
    %45 = arith.addf %44, %15 : vector<8x4xf32>
    %cst_17 = arith.constant 9.990000e-01 : f32
    %46 = vector.broadcast %cst_17 : f32 to vector<8x4xf32>
    %47 = arith.mulf %46, %33 : vector<8x4xf32>
    %48 = arith.addf %47, %15 : vector<8x4xf32>
    %49 = arith.addf %48, %39 : vector<8x4xf32>
    %50 = arith.select %11, %49, %45 : vector<8x4xi1>, vector<8x4xf32>
    %cst_18 = arith.constant 9.990000e-01 : f32
    %51 = vector.broadcast %cst_18 : f32 to vector<8x4xf32>
    %52 = arith.mulf %51, %36 : vector<8x4xf32>
    %53 = arith.mulf %49, %17 : vector<8x4xf32>
    %54 = arith.subf %52, %53 : vector<8x4xf32>
    %55 = arith.subf %54, %19 : vector<8x4xf32>
    %cst_19 = arith.constant 9.990000e-01 : f32
    %56 = vector.broadcast %cst_19 : f32 to vector<8x4xf32>
    %57 = arith.mulf %56, %50 : vector<8x4xf32>
    %58 = arith.subf %50, %49 : vector<8x4xf32>
    %59 = arith.mulf %58, %13 : vector<8x4xf32>
    %60 = arith.subf %57, %59 : vector<8x4xf32>
    %61 = arith.addf %60, %15 : vector<8x4xf32>
    %cst_20 = arith.constant 9.990000e-01 : f32
    %62 = vector.broadcast %cst_20 : f32 to vector<8x4xf32>
    %63 = arith.mulf %62, %49 : vector<8x4xf32>
    %64 = arith.addf %63, %15 : vector<8x4xf32>
    %65 = arith.addf %64, %55 : vector<8x4xf32>
    %66 = arith.select %11, %65, %61 : vector<8x4xi1>, vector<8x4xf32>
    %cst_21 = arith.constant 9.990000e-01 : f32
    %67 = vector.broadcast %cst_21 : f32 to vector<8x4xf32>
    %68 = arith.mulf %67, %52 : vector<8x4xf32>
    %69 = arith.mulf %65, %17 : vector<8x4xf32>
    %70 = arith.subf %68, %69 : vector<8x4xf32>
    %71 = arith.subf %70, %19 : vector<8x4xf32>
    %cst_22 = arith.constant 9.990000e-01 : f32
    %72 = vector.broadcast %cst_22 : f32 to vector<8x4xf32>
    %73 = arith.mulf %72, %66 : vector<8x4xf32>
    %74 = arith.subf %66, %65 : vector<8x4xf32>
    %75 = arith.mulf %74, %13 : vector<8x4xf32>
    %76 = arith.subf %73, %75 : vector<8x4xf32>
    %77 = arith.addf %76, %15 : vector<8x4xf32>
    %cst_23 = arith.constant 9.990000e-01 : f32
    %78 = vector.broadcast %cst_23 : f32 to vector<8x4xf32>
    %79 = arith.mulf %78, %65 : vector<8x4xf32>
    %80 = arith.addf %79, %15 : vector<8x4xf32>
    %81 = arith.addf %80, %71 : vector<8x4xf32>
    %82 = arith.select %11, %81, %77 : vector<8x4xi1>, vector<8x4xf32>
    %cst_24 = arith.constant 9.990000e-01 : f32
    %83 = vector.broadcast %cst_24 : f32 to vector<8x4xf32>
    %84 = arith.mulf %83, %68 : vector<8x4xf32>
    %85 = arith.mulf %81, %17 : vector<8x4xf32>
    %86 = arith.subf %84, %85 : vector<8x4xf32>
    %87 = arith.subf %86, %19 : vector<8x4xf32>
    %cst_25 = arith.constant 9.990000e-01 : f32
    %88 = vector.broadcast %cst_25 : f32 to vector<8x4xf32>
    %89 = arith.mulf %88, %82 : vector<8x4xf32>
    %90 = arith.subf %82, %81 : vector<8x4xf32>
    %91 = arith.mulf %90, %13 : vector<8x4xf32>
    %92 = arith.subf %89, %91 : vector<8x4xf32>
    %93 = arith.addf %92, %15 : vector<8x4xf32>
    %cst_26 = arith.constant 9.990000e-01 : f32
    %94 = vector.broadcast %cst_26 : f32 to vector<8x4xf32>
    %95 = arith.mulf %94, %81 : vector<8x4xf32>
    %96 = arith.addf %95, %15 : vector<8x4xf32>
    %97 = arith.addf %96, %87 : vector<8x4xf32>
    %98 = arith.select %11, %97, %93 : vector<8x4xi1>, vector<8x4xf32>
    %cst_27 = arith.constant 9.990000e-01 : f32
    %99 = vector.broadcast %cst_27 : f32 to vector<8x4xf32>
    %100 = arith.mulf %99, %84 : vector<8x4xf32>
    %101 = arith.mulf %97, %17 : vector<8x4xf32>
    %102 = arith.subf %100, %101 : vector<8x4xf32>
    %103 = arith.subf %102, %19 : vector<8x4xf32>
    %cst_28 = arith.constant 9.990000e-01 : f32
    %104 = vector.broadcast %cst_28 : f32 to vector<8x4xf32>
    %105 = arith.mulf %104, %98 : vector<8x4xf32>
    %106 = arith.subf %98, %97 : vector<8x4xf32>
    %107 = arith.mulf %106, %13 : vector<8x4xf32>
    %108 = arith.subf %105, %107 : vector<8x4xf32>
    %109 = arith.addf %108, %15 : vector<8x4xf32>
    %cst_29 = arith.constant 9.990000e-01 : f32
    %110 = vector.broadcast %cst_29 : f32 to vector<8x4xf32>
    %111 = arith.mulf %110, %97 : vector<8x4xf32>
    %112 = arith.addf %111, %15 : vector<8x4xf32>
    %113 = arith.addf %112, %103 : vector<8x4xf32>
    %114 = arith.select %11, %113, %109 : vector<8x4xi1>, vector<8x4xf32>
    %cst_30 = arith.constant 9.990000e-01 : f32
    %115 = vector.broadcast %cst_30 : f32 to vector<8x4xf32>
    %116 = arith.mulf %115, %100 : vector<8x4xf32>
    %117 = arith.mulf %113, %17 : vector<8x4xf32>
    %118 = arith.subf %116, %117 : vector<8x4xf32>
    %119 = arith.subf %118, %19 : vector<8x4xf32>
    %cst_31 = arith.constant 9.990000e-01 : f32
    %120 = vector.broadcast %cst_31 : f32 to vector<8x4xf32>
    %121 = arith.mulf %120, %114 : vector<8x4xf32>
    %122 = arith.subf %114, %113 : vector<8x4xf32>
    %123 = arith.mulf %122, %13 : vector<8x4xf32>
    %124 = arith.subf %121, %123 : vector<8x4xf32>
    %125 = arith.addf %124, %15 : vector<8x4xf32>
    %cst_32 = arith.constant 9.990000e-01 : f32
    %126 = vector.broadcast %cst_32 : f32 to vector<8x4xf32>
    %127 = arith.mulf %126, %113 : vector<8x4xf32>
    %128 = arith.addf %127, %15 : vector<8x4xf32>
    %129 = arith.addf %128, %119 : vector<8x4xf32>
    %130 = arith.select %11, %129, %125 : vector<8x4xi1>, vector<8x4xf32>
    %cst_33 = arith.constant 9.990000e-01 : f32
    %131 = vector.broadcast %cst_33 : f32 to vector<8x4xf32>
    %132 = arith.mulf %131, %116 : vector<8x4xf32>
    %133 = arith.mulf %129, %17 : vector<8x4xf32>
    %134 = arith.subf %132, %133 : vector<8x4xf32>
    %135 = arith.subf %134, %19 : vector<8x4xf32>
    %cst_34 = arith.constant 9.990000e-01 : f32
    %136 = vector.broadcast %cst_34 : f32 to vector<8x4xf32>
    %137 = arith.mulf %136, %130 : vector<8x4xf32>
    %138 = arith.subf %130, %129 : vector<8x4xf32>
    %139 = arith.mulf %138, %13 : vector<8x4xf32>
    %140 = arith.subf %137, %139 : vector<8x4xf32>
    %141 = arith.addf %140, %15 : vector<8x4xf32>
    %cst_35 = arith.constant 9.990000e-01 : f32
    %142 = vector.broadcast %cst_35 : f32 to vector<8x4xf32>
    %143 = arith.mulf %142, %129 : vector<8x4xf32>
    %144 = arith.addf %143, %15 : vector<8x4xf32>
    %145 = arith.addf %144, %135 : vector<8x4xf32>
    %146 = arith.select %11, %145, %141 : vector<8x4xi1>, vector<8x4xf32>
    %cst_36 = arith.constant 9.990000e-01 : f32
    %147 = vector.broadcast %cst_36 : f32 to vector<8x4xf32>
    %148 = arith.mulf %147, %132 : vector<8x4xf32>
    %149 = arith.mulf %145, %17 : vector<8x4xf32>
    %150 = arith.subf %148, %149 : vector<8x4xf32>
    %151 = arith.subf %150, %19 : vector<8x4xf32>
    %cst_37 = arith.constant 9.990000e-01 : f32
    %152 = vector.broadcast %cst_37 : f32 to vector<8x4xf32>
    %153 = arith.mulf %152, %146 : vector<8x4xf32>
    %154 = arith.subf %146, %145 : vector<8x4xf32>
    %155 = arith.mulf %154, %13 : vector<8x4xf32>
    %156 = arith.subf %153, %155 : vector<8x4xf32>
    %157 = arith.addf %156, %15 : vector<8x4xf32>
    %cst_38 = arith.constant 9.990000e-01 : f32
    %158 = vector.broadcast %cst_38 : f32 to vector<8x4xf32>
    %159 = arith.mulf %158, %145 : vector<8x4xf32>
    %160 = arith.addf %159, %15 : vector<8x4xf32>
    %161 = arith.addf %160, %151 : vector<8x4xf32>
    %162 = arith.select %11, %161, %157 : vector<8x4xi1>, vector<8x4xf32>
    %cst_39 = arith.constant 9.990000e-01 : f32
    %163 = vector.broadcast %cst_39 : f32 to vector<8x4xf32>
    %164 = arith.mulf %163, %148 : vector<8x4xf32>
    %165 = arith.mulf %161, %17 : vector<8x4xf32>
    %166 = arith.subf %164, %165 : vector<8x4xf32>
    %167 = arith.subf %166, %19 : vector<8x4xf32>
    %cst_40 = arith.constant 9.990000e-01 : f32
    %168 = vector.broadcast %cst_40 : f32 to vector<8x4xf32>
    %169 = arith.mulf %168, %162 : vector<8x4xf32>
    %170 = arith.subf %162, %161 : vector<8x4xf32>
    %171 = arith.mulf %170, %13 : vector<8x4xf32>
    %172 = arith.subf %169, %171 : vector<8x4xf32>
    %173 = arith.addf %172, %15 : vector<8x4xf32>
    %cst_41 = arith.constant 9.990000e-01 : f32
    %174 = vector.broadcast %cst_41 : f32 to vector<8x4xf32>
    %175 = arith.mulf %174, %161 : vector<8x4xf32>
    %176 = arith.addf %175, %15 : vector<8x4xf32>
    %177 = arith.addf %176, %167 : vector<8x4xf32>
    %178 = arith.select %11, %177, %173 : vector<8x4xi1>, vector<8x4xf32>
    %cst_42 = arith.constant 9.990000e-01 : f32
    %179 = vector.broadcast %cst_42 : f32 to vector<8x4xf32>
    %180 = arith.mulf %179, %164 : vector<8x4xf32>
    %181 = arith.mulf %177, %17 : vector<8x4xf32>
    %182 = arith.subf %180, %181 : vector<8x4xf32>
    %183 = arith.subf %182, %19 : vector<8x4xf32>
    %cst_43 = arith.constant 9.990000e-01 : f32
    %184 = vector.broadcast %cst_43 : f32 to vector<8x4xf32>
    %185 = arith.mulf %184, %178 : vector<8x4xf32>
    %186 = arith.subf %178, %177 : vector<8x4xf32>
    %187 = arith.mulf %186, %13 : vector<8x4xf32>
    %188 = arith.subf %185, %187 : vector<8x4xf32>
    %189 = arith.addf %188, %15 : vector<8x4xf32>
    %cst_44 = arith.constant 9.990000e-01 : f32
    %190 = vector.broadcast %cst_44 : f32 to vector<8x4xf32>
    %191 = arith.mulf %190, %177 : vector<8x4xf32>
    %192 = arith.addf %191, %15 : vector<8x4xf32>
    %193 = arith.addf %192, %183 : vector<8x4xf32>
    %194 = arith.select %11, %193, %189 : vector<8x4xi1>, vector<8x4xf32>
    %cst_45 = arith.constant 9.990000e-01 : f32
    %195 = vector.broadcast %cst_45 : f32 to vector<8x4xf32>
    %196 = arith.mulf %195, %180 : vector<8x4xf32>
    %197 = arith.mulf %193, %17 : vector<8x4xf32>
    %198 = arith.subf %196, %197 : vector<8x4xf32>
    %199 = arith.subf %198, %19 : vector<8x4xf32>
    %cst_46 = arith.constant 9.990000e-01 : f32
    %200 = vector.broadcast %cst_46 : f32 to vector<8x4xf32>
    %201 = arith.mulf %200, %194 : vector<8x4xf32>
    %202 = arith.subf %194, %193 : vector<8x4xf32>
    %203 = arith.mulf %202, %13 : vector<8x4xf32>
    %204 = arith.subf %201, %203 : vector<8x4xf32>
    %205 = arith.addf %204, %15 : vector<8x4xf32>
    %cst_47 = arith.constant 9.990000e-01 : f32
    %206 = vector.broadcast %cst_47 : f32 to vector<8x4xf32>
    %207 = arith.mulf %206, %193 : vector<8x4xf32>
    %208 = arith.addf %207, %15 : vector<8x4xf32>
    %209 = arith.addf %208, %199 : vector<8x4xf32>
    %210 = arith.select %11, %209, %205 : vector<8x4xi1>, vector<8x4xf32>
    %cst_48 = arith.constant 9.990000e-01 : f32
    %211 = vector.broadcast %cst_48 : f32 to vector<8x4xf32>
    %212 = arith.mulf %211, %196 : vector<8x4xf32>
    %213 = arith.mulf %209, %17 : vector<8x4xf32>
    %214 = arith.subf %212, %213 : vector<8x4xf32>
    %215 = arith.subf %214, %19 : vector<8x4xf32>
    %cst_49 = arith.constant 9.990000e-01 : f32
    %216 = vector.broadcast %cst_49 : f32 to vector<8x4xf32>
    %217 = arith.mulf %216, %210 : vector<8x4xf32>
    %218 = arith.subf %210, %209 : vector<8x4xf32>
    %219 = arith.mulf %218, %13 : vector<8x4xf32>
    %220 = arith.subf %217, %219 : vector<8x4xf32>
    %221 = arith.addf %220, %15 : vector<8x4xf32>
    %cst_50 = arith.constant 9.990000e-01 : f32
    %222 = vector.broadcast %cst_50 : f32 to vector<8x4xf32>
    %223 = arith.mulf %222, %209 : vector<8x4xf32>
    %224 = arith.addf %223, %15 : vector<8x4xf32>
    %225 = arith.addf %224, %215 : vector<8x4xf32>
    %226 = arith.select %11, %225, %221 : vector<8x4xi1>, vector<8x4xf32>
    %cst_51 = arith.constant 9.990000e-01 : f32
    %227 = vector.broadcast %cst_51 : f32 to vector<8x4xf32>
    %228 = arith.mulf %227, %212 : vector<8x4xf32>
    %229 = arith.mulf %225, %17 : vector<8x4xf32>
    %230 = arith.subf %228, %229 : vector<8x4xf32>
    %231 = arith.subf %230, %19 : vector<8x4xf32>
    %cst_52 = arith.constant 9.990000e-01 : f32
    %232 = vector.broadcast %cst_52 : f32 to vector<8x4xf32>
    %233 = arith.mulf %232, %226 : vector<8x4xf32>
    %234 = arith.subf %226, %225 : vector<8x4xf32>
    %235 = arith.mulf %234, %13 : vector<8x4xf32>
    %236 = arith.subf %233, %235 : vector<8x4xf32>
    %237 = arith.addf %236, %15 : vector<8x4xf32>
    %cst_53 = arith.constant 9.990000e-01 : f32
    %238 = vector.broadcast %cst_53 : f32 to vector<8x4xf32>
    %239 = arith.mulf %238, %225 : vector<8x4xf32>
    %240 = arith.addf %239, %15 : vector<8x4xf32>
    %241 = arith.addf %240, %231 : vector<8x4xf32>
    %242 = arith.select %11, %241, %237 : vector<8x4xi1>, vector<8x4xf32>
    %cst_54 = arith.constant 9.990000e-01 : f32
    %243 = vector.broadcast %cst_54 : f32 to vector<8x4xf32>
    %244 = arith.mulf %243, %228 : vector<8x4xf32>
    %245 = arith.mulf %241, %17 : vector<8x4xf32>
    %246 = arith.subf %244, %245 : vector<8x4xf32>
    %247 = arith.subf %246, %19 : vector<8x4xf32>
    %cst_55 = arith.constant 9.990000e-01 : f32
    %248 = vector.broadcast %cst_55 : f32 to vector<8x4xf32>
    %249 = arith.mulf %248, %242 : vector<8x4xf32>
    %250 = arith.subf %242, %241 : vector<8x4xf32>
    %251 = arith.mulf %250, %13 : vector<8x4xf32>
    %252 = arith.subf %249, %251 : vector<8x4xf32>
    %253 = arith.addf %252, %15 : vector<8x4xf32>
    %cst_56 = arith.constant 9.990000e-01 : f32
    %254 = vector.broadcast %cst_56 : f32 to vector<8x4xf32>
    %255 = arith.mulf %254, %241 : vector<8x4xf32>
    %256 = arith.addf %255, %15 : vector<8x4xf32>
    %257 = arith.addf %256, %247 : vector<8x4xf32>
    %258 = arith.select %11, %257, %253 : vector<8x4xi1>, vector<8x4xf32>
    %cst_57 = arith.constant 9.990000e-01 : f32
    %259 = vector.broadcast %cst_57 : f32 to vector<8x4xf32>
    %260 = arith.mulf %259, %244 : vector<8x4xf32>
    %261 = arith.mulf %257, %17 : vector<8x4xf32>
    %262 = arith.subf %260, %261 : vector<8x4xf32>
    %263 = arith.subf %262, %19 : vector<8x4xf32>
    %cst_58 = arith.constant 9.990000e-01 : f32
    %264 = vector.broadcast %cst_58 : f32 to vector<8x4xf32>
    %265 = arith.mulf %264, %258 : vector<8x4xf32>
    %266 = arith.subf %258, %257 : vector<8x4xf32>
    %267 = arith.mulf %266, %13 : vector<8x4xf32>
    %268 = arith.subf %265, %267 : vector<8x4xf32>
    %269 = arith.addf %268, %15 : vector<8x4xf32>
    %cst_59 = arith.constant 9.990000e-01 : f32
    %270 = vector.broadcast %cst_59 : f32 to vector<8x4xf32>
    %271 = arith.mulf %270, %257 : vector<8x4xf32>
    %272 = arith.addf %271, %15 : vector<8x4xf32>
    %273 = arith.addf %272, %263 : vector<8x4xf32>
    %274 = arith.select %11, %273, %269 : vector<8x4xi1>, vector<8x4xf32>
    %cst_60 = arith.constant 9.990000e-01 : f32
    %275 = vector.broadcast %cst_60 : f32 to vector<8x4xf32>
    %276 = arith.mulf %275, %260 : vector<8x4xf32>
    %277 = arith.mulf %273, %17 : vector<8x4xf32>
    %278 = arith.subf %276, %277 : vector<8x4xf32>
    %279 = arith.subf %278, %19 : vector<8x4xf32>
    %cst_61 = arith.constant 9.990000e-01 : f32
    %280 = vector.broadcast %cst_61 : f32 to vector<8x4xf32>
    %281 = arith.mulf %280, %274 : vector<8x4xf32>
    %282 = arith.subf %274, %273 : vector<8x4xf32>
    %283 = arith.mulf %282, %13 : vector<8x4xf32>
    %284 = arith.subf %281, %283 : vector<8x4xf32>
    %285 = arith.addf %284, %15 : vector<8x4xf32>
    %cst_62 = arith.constant 9.990000e-01 : f32
    %286 = vector.broadcast %cst_62 : f32 to vector<8x4xf32>
    %287 = arith.mulf %286, %273 : vector<8x4xf32>
    %288 = arith.addf %287, %15 : vector<8x4xf32>
    %289 = arith.addf %288, %279 : vector<8x4xf32>
    %290 = arith.select %11, %289, %285 : vector<8x4xi1>, vector<8x4xf32>
    %cst_63 = arith.constant 9.990000e-01 : f32
    %291 = vector.broadcast %cst_63 : f32 to vector<8x4xf32>
    %292 = arith.mulf %291, %276 : vector<8x4xf32>
    %293 = arith.mulf %289, %17 : vector<8x4xf32>
    %294 = arith.subf %292, %293 : vector<8x4xf32>
    %295 = arith.subf %294, %19 : vector<8x4xf32>
    %cst_64 = arith.constant 9.990000e-01 : f32
    %296 = vector.broadcast %cst_64 : f32 to vector<8x4xf32>
    %297 = arith.mulf %296, %290 : vector<8x4xf32>
    %298 = arith.subf %290, %289 : vector<8x4xf32>
    %299 = arith.mulf %298, %13 : vector<8x4xf32>
    %300 = arith.subf %297, %299 : vector<8x4xf32>
    %301 = arith.addf %300, %15 : vector<8x4xf32>
    %cst_65 = arith.constant 9.990000e-01 : f32
    %302 = vector.broadcast %cst_65 : f32 to vector<8x4xf32>
    %303 = arith.mulf %302, %289 : vector<8x4xf32>
    %304 = arith.addf %303, %15 : vector<8x4xf32>
    %305 = arith.addf %304, %295 : vector<8x4xf32>
    %306 = arith.select %11, %305, %301 : vector<8x4xi1>, vector<8x4xf32>
    %cst_66 = arith.constant 9.990000e-01 : f32
    %307 = vector.broadcast %cst_66 : f32 to vector<8x4xf32>
    %308 = arith.mulf %307, %292 : vector<8x4xf32>
    %309 = arith.mulf %305, %17 : vector<8x4xf32>
    %310 = arith.subf %308, %309 : vector<8x4xf32>
    %311 = arith.subf %310, %19 : vector<8x4xf32>
    %cst_67 = arith.constant 9.990000e-01 : f32
    %312 = vector.broadcast %cst_67 : f32 to vector<8x4xf32>
    %313 = arith.mulf %312, %306 : vector<8x4xf32>
    %314 = arith.subf %306, %305 : vector<8x4xf32>
    %315 = arith.mulf %314, %13 : vector<8x4xf32>
    %316 = arith.subf %313, %315 : vector<8x4xf32>
    %317 = arith.addf %316, %15 : vector<8x4xf32>
    %cst_68 = arith.constant 9.990000e-01 : f32
    %318 = vector.broadcast %cst_68 : f32 to vector<8x4xf32>
    %319 = arith.mulf %318, %305 : vector<8x4xf32>
    %320 = arith.addf %319, %15 : vector<8x4xf32>
    %321 = arith.addf %320, %311 : vector<8x4xf32>
    %322 = arith.select %11, %321, %317 : vector<8x4xi1>, vector<8x4xf32>
    %cst_69 = arith.constant 9.990000e-01 : f32
    %323 = vector.broadcast %cst_69 : f32 to vector<8x4xf32>
    %324 = arith.mulf %323, %308 : vector<8x4xf32>
    %325 = arith.mulf %321, %17 : vector<8x4xf32>
    %326 = arith.subf %324, %325 : vector<8x4xf32>
    %327 = arith.subf %326, %19 : vector<8x4xf32>
    %cst_70 = arith.constant 9.990000e-01 : f32
    %328 = vector.broadcast %cst_70 : f32 to vector<8x4xf32>
    %329 = arith.mulf %328, %322 : vector<8x4xf32>
    %330 = arith.subf %322, %321 : vector<8x4xf32>
    %331 = arith.mulf %330, %13 : vector<8x4xf32>
    %332 = arith.subf %329, %331 : vector<8x4xf32>
    %333 = arith.addf %332, %15 : vector<8x4xf32>
    %cst_71 = arith.constant 9.990000e-01 : f32
    %334 = vector.broadcast %cst_71 : f32 to vector<8x4xf32>
    %335 = arith.mulf %334, %321 : vector<8x4xf32>
    %336 = arith.addf %335, %15 : vector<8x4xf32>
    %337 = arith.addf %336, %327 : vector<8x4xf32>
    %338 = arith.select %11, %337, %333 : vector<8x4xi1>, vector<8x4xf32>
    %cst_72 = arith.constant 9.990000e-01 : f32
    %339 = vector.broadcast %cst_72 : f32 to vector<8x4xf32>
    %340 = arith.mulf %339, %324 : vector<8x4xf32>
    %341 = arith.mulf %337, %17 : vector<8x4xf32>
    %342 = arith.subf %340, %341 : vector<8x4xf32>
    %343 = arith.subf %342, %19 : vector<8x4xf32>
    %cst_73 = arith.constant 9.990000e-01 : f32
    %344 = vector.broadcast %cst_73 : f32 to vector<8x4xf32>
    %345 = arith.mulf %344, %338 : vector<8x4xf32>
    %346 = arith.subf %338, %337 : vector<8x4xf32>
    %347 = arith.mulf %346, %13 : vector<8x4xf32>
    %348 = arith.subf %345, %347 : vector<8x4xf32>
    %349 = arith.addf %348, %15 : vector<8x4xf32>
    %cst_74 = arith.constant 9.990000e-01 : f32
    %350 = vector.broadcast %cst_74 : f32 to vector<8x4xf32>
    %351 = arith.mulf %350, %337 : vector<8x4xf32>
    %352 = arith.addf %351, %15 : vector<8x4xf32>
    %353 = arith.addf %352, %343 : vector<8x4xf32>
    %354 = arith.select %11, %353, %349 : vector<8x4xi1>, vector<8x4xf32>
    %cst_75 = arith.constant 9.990000e-01 : f32
    %355 = vector.broadcast %cst_75 : f32 to vector<8x4xf32>
    %356 = arith.mulf %355, %340 : vector<8x4xf32>
    %357 = arith.mulf %353, %17 : vector<8x4xf32>
    %358 = arith.subf %356, %357 : vector<8x4xf32>
    %359 = arith.subf %358, %19 : vector<8x4xf32>
    %cst_76 = arith.constant 9.990000e-01 : f32
    %360 = vector.broadcast %cst_76 : f32 to vector<8x4xf32>
    %361 = arith.mulf %360, %354 : vector<8x4xf32>
    %362 = arith.subf %354, %353 : vector<8x4xf32>
    %363 = arith.mulf %362, %13 : vector<8x4xf32>
    %364 = arith.subf %361, %363 : vector<8x4xf32>
    %365 = arith.addf %364, %15 : vector<8x4xf32>
    %cst_77 = arith.constant 9.990000e-01 : f32
    %366 = vector.broadcast %cst_77 : f32 to vector<8x4xf32>
    %367 = arith.mulf %366, %353 : vector<8x4xf32>
    %368 = arith.addf %367, %15 : vector<8x4xf32>
    %369 = arith.addf %368, %359 : vector<8x4xf32>
    %370 = arith.select %11, %369, %365 : vector<8x4xi1>, vector<8x4xf32>
    %cst_78 = arith.constant 9.990000e-01 : f32
    %371 = vector.broadcast %cst_78 : f32 to vector<8x4xf32>
    %372 = arith.mulf %371, %356 : vector<8x4xf32>
    %373 = arith.mulf %369, %17 : vector<8x4xf32>
    %374 = arith.subf %372, %373 : vector<8x4xf32>
    %375 = arith.subf %374, %19 : vector<8x4xf32>
    %cst_79 = arith.constant 9.990000e-01 : f32
    %376 = vector.broadcast %cst_79 : f32 to vector<8x4xf32>
    %377 = arith.mulf %376, %370 : vector<8x4xf32>
    %378 = arith.subf %370, %369 : vector<8x4xf32>
    %379 = arith.mulf %378, %13 : vector<8x4xf32>
    %380 = arith.subf %377, %379 : vector<8x4xf32>
    %381 = arith.addf %380, %15 : vector<8x4xf32>
    %cst_80 = arith.constant 9.990000e-01 : f32
    %382 = vector.broadcast %cst_80 : f32 to vector<8x4xf32>
    %383 = arith.mulf %382, %369 : vector<8x4xf32>
    %384 = arith.addf %383, %15 : vector<8x4xf32>
    %385 = arith.addf %384, %375 : vector<8x4xf32>
    %386 = arith.select %11, %385, %381 : vector<8x4xi1>, vector<8x4xf32>
    %cst_81 = arith.constant 9.990000e-01 : f32
    %387 = vector.broadcast %cst_81 : f32 to vector<8x4xf32>
    %388 = arith.mulf %387, %372 : vector<8x4xf32>
    %389 = arith.mulf %385, %17 : vector<8x4xf32>
    %390 = arith.subf %388, %389 : vector<8x4xf32>
    %391 = arith.subf %390, %19 : vector<8x4xf32>
    %cst_82 = arith.constant 9.990000e-01 : f32
    %392 = vector.broadcast %cst_82 : f32 to vector<8x4xf32>
    %393 = arith.mulf %392, %386 : vector<8x4xf32>
    %394 = arith.subf %386, %385 : vector<8x4xf32>
    %395 = arith.mulf %394, %13 : vector<8x4xf32>
    %396 = arith.subf %393, %395 : vector<8x4xf32>
    %397 = arith.addf %396, %15 : vector<8x4xf32>
    %cst_83 = arith.constant 9.990000e-01 : f32
    %398 = vector.broadcast %cst_83 : f32 to vector<8x4xf32>
    %399 = arith.mulf %398, %385 : vector<8x4xf32>
    %400 = arith.addf %399, %15 : vector<8x4xf32>
    %401 = arith.addf %400, %391 : vector<8x4xf32>
    %402 = arith.select %11, %401, %397 : vector<8x4xi1>, vector<8x4xf32>
    %cst_84 = arith.constant 9.990000e-01 : f32
    %403 = vector.broadcast %cst_84 : f32 to vector<8x4xf32>
    %404 = arith.mulf %403, %388 : vector<8x4xf32>
    %405 = arith.mulf %401, %17 : vector<8x4xf32>
    %406 = arith.subf %404, %405 : vector<8x4xf32>
    %407 = arith.subf %406, %19 : vector<8x4xf32>
    %cst_85 = arith.constant 9.990000e-01 : f32
    %408 = vector.broadcast %cst_85 : f32 to vector<8x4xf32>
    %409 = arith.mulf %408, %402 : vector<8x4xf32>
    %410 = arith.subf %402, %401 : vector<8x4xf32>
    %411 = arith.mulf %410, %13 : vector<8x4xf32>
    %412 = arith.subf %409, %411 : vector<8x4xf32>
    %413 = arith.addf %412, %15 : vector<8x4xf32>
    %cst_86 = arith.constant 9.990000e-01 : f32
    %414 = vector.broadcast %cst_86 : f32 to vector<8x4xf32>
    %415 = arith.mulf %414, %401 : vector<8x4xf32>
    %416 = arith.addf %415, %15 : vector<8x4xf32>
    %417 = arith.addf %416, %407 : vector<8x4xf32>
    %418 = arith.select %11, %417, %413 : vector<8x4xi1>, vector<8x4xf32>
    %cst_87 = arith.constant 9.990000e-01 : f32
    %419 = vector.broadcast %cst_87 : f32 to vector<8x4xf32>
    %420 = arith.mulf %419, %404 : vector<8x4xf32>
    %421 = arith.mulf %417, %17 : vector<8x4xf32>
    %422 = arith.subf %420, %421 : vector<8x4xf32>
    %423 = arith.subf %422, %19 : vector<8x4xf32>
    %cst_88 = arith.constant 9.990000e-01 : f32
    %424 = vector.broadcast %cst_88 : f32 to vector<8x4xf32>
    %425 = arith.mulf %424, %418 : vector<8x4xf32>
    %426 = arith.subf %418, %417 : vector<8x4xf32>
    %427 = arith.mulf %426, %13 : vector<8x4xf32>
    %428 = arith.subf %425, %427 : vector<8x4xf32>
    %429 = arith.addf %428, %15 : vector<8x4xf32>
    %cst_89 = arith.constant 9.990000e-01 : f32
    %430 = vector.broadcast %cst_89 : f32 to vector<8x4xf32>
    %431 = arith.mulf %430, %417 : vector<8x4xf32>
    %432 = arith.addf %431, %15 : vector<8x4xf32>
    %433 = arith.addf %432, %423 : vector<8x4xf32>
    %434 = arith.select %11, %433, %429 : vector<8x4xi1>, vector<8x4xf32>
    %cst_90 = arith.constant 9.990000e-01 : f32
    %435 = vector.broadcast %cst_90 : f32 to vector<8x4xf32>
    %436 = arith.mulf %435, %420 : vector<8x4xf32>
    %437 = arith.mulf %433, %17 : vector<8x4xf32>
    %438 = arith.subf %436, %437 : vector<8x4xf32>
    %439 = arith.subf %438, %19 : vector<8x4xf32>
    %cst_91 = arith.constant 9.990000e-01 : f32
    %440 = vector.broadcast %cst_91 : f32 to vector<8x4xf32>
    %441 = arith.mulf %440, %434 : vector<8x4xf32>
    %442 = arith.subf %434, %433 : vector<8x4xf32>
    %443 = arith.mulf %442, %13 : vector<8x4xf32>
    %444 = arith.subf %441, %443 : vector<8x4xf32>
    %445 = arith.addf %444, %15 : vector<8x4xf32>
    %cst_92 = arith.constant 9.990000e-01 : f32
    %446 = vector.broadcast %cst_92 : f32 to vector<8x4xf32>
    %447 = arith.mulf %446, %433 : vector<8x4xf32>
    %448 = arith.addf %447, %15 : vector<8x4xf32>
    %449 = arith.addf %448, %439 : vector<8x4xf32>
    %450 = arith.select %11, %449, %445 : vector<8x4xi1>, vector<8x4xf32>
    %cst_93 = arith.constant 9.990000e-01 : f32
    %451 = vector.broadcast %cst_93 : f32 to vector<8x4xf32>
    %452 = arith.mulf %451, %436 : vector<8x4xf32>
    %453 = arith.mulf %449, %17 : vector<8x4xf32>
    %454 = arith.subf %452, %453 : vector<8x4xf32>
    %455 = arith.subf %454, %19 : vector<8x4xf32>
    %cst_94 = arith.constant 9.990000e-01 : f32
    %456 = vector.broadcast %cst_94 : f32 to vector<8x4xf32>
    %457 = arith.mulf %456, %450 : vector<8x4xf32>
    %458 = arith.subf %450, %449 : vector<8x4xf32>
    %459 = arith.mulf %458, %13 : vector<8x4xf32>
    %460 = arith.subf %457, %459 : vector<8x4xf32>
    %461 = arith.addf %460, %15 : vector<8x4xf32>
    %cst_95 = arith.constant 9.990000e-01 : f32
    %462 = vector.broadcast %cst_95 : f32 to vector<8x4xf32>
    %463 = arith.mulf %462, %449 : vector<8x4xf32>
    %464 = arith.addf %463, %15 : vector<8x4xf32>
    %465 = arith.addf %464, %455 : vector<8x4xf32>
    %466 = arith.select %11, %465, %461 : vector<8x4xi1>, vector<8x4xf32>
    %cst_96 = arith.constant 9.990000e-01 : f32
    %467 = vector.broadcast %cst_96 : f32 to vector<8x4xf32>
    %468 = arith.mulf %467, %452 : vector<8x4xf32>
    %469 = arith.mulf %465, %17 : vector<8x4xf32>
    %470 = arith.subf %468, %469 : vector<8x4xf32>
    %471 = arith.subf %470, %19 : vector<8x4xf32>
    %cst_97 = arith.constant 9.990000e-01 : f32
    %472 = vector.broadcast %cst_97 : f32 to vector<8x4xf32>
    %473 = arith.mulf %472, %466 : vector<8x4xf32>
    %474 = arith.subf %466, %465 : vector<8x4xf32>
    %475 = arith.mulf %474, %13 : vector<8x4xf32>
    %476 = arith.subf %473, %475 : vector<8x4xf32>
    %477 = arith.addf %476, %15 : vector<8x4xf32>
    %cst_98 = arith.constant 9.990000e-01 : f32
    %478 = vector.broadcast %cst_98 : f32 to vector<8x4xf32>
    %479 = arith.mulf %478, %465 : vector<8x4xf32>
    %480 = arith.addf %479, %15 : vector<8x4xf32>
    %481 = arith.addf %480, %471 : vector<8x4xf32>
    %482 = arith.select %11, %481, %477 : vector<8x4xi1>, vector<8x4xf32>
    %cst_99 = arith.constant 9.990000e-01 : f32
    %483 = vector.broadcast %cst_99 : f32 to vector<8x4xf32>
    %484 = arith.mulf %483, %468 : vector<8x4xf32>
    %485 = arith.mulf %481, %17 : vector<8x4xf32>
    %486 = arith.subf %484, %485 : vector<8x4xf32>
    %487 = arith.subf %486, %19 : vector<8x4xf32>
    %cst_100 = arith.constant 9.990000e-01 : f32
    %488 = vector.broadcast %cst_100 : f32 to vector<8x4xf32>
    %489 = arith.mulf %488, %482 : vector<8x4xf32>
    %490 = arith.subf %482, %481 : vector<8x4xf32>
    %491 = arith.mulf %490, %13 : vector<8x4xf32>
    %492 = arith.subf %489, %491 : vector<8x4xf32>
    %493 = arith.addf %492, %15 : vector<8x4xf32>
    %cst_101 = arith.constant 9.990000e-01 : f32
    %494 = vector.broadcast %cst_101 : f32 to vector<8x4xf32>
    %495 = arith.mulf %494, %481 : vector<8x4xf32>
    %496 = arith.addf %495, %15 : vector<8x4xf32>
    %497 = arith.addf %496, %487 : vector<8x4xf32>
    %498 = arith.select %11, %497, %493 : vector<8x4xi1>, vector<8x4xf32>
    %cst_102 = arith.constant 9.990000e-01 : f32
    %499 = vector.broadcast %cst_102 : f32 to vector<8x4xf32>
    %500 = arith.mulf %499, %484 : vector<8x4xf32>
    %501 = arith.mulf %497, %17 : vector<8x4xf32>
    %502 = arith.subf %500, %501 : vector<8x4xf32>
    %503 = arith.subf %502, %19 : vector<8x4xf32>
    %cst_103 = arith.constant 9.990000e-01 : f32
    %504 = vector.broadcast %cst_103 : f32 to vector<8x4xf32>
    %505 = arith.mulf %504, %498 : vector<8x4xf32>
    %506 = arith.subf %498, %497 : vector<8x4xf32>
    %507 = arith.mulf %506, %13 : vector<8x4xf32>
    %508 = arith.subf %505, %507 : vector<8x4xf32>
    %509 = arith.addf %508, %15 : vector<8x4xf32>
    %cst_104 = arith.constant 9.990000e-01 : f32
    %510 = vector.broadcast %cst_104 : f32 to vector<8x4xf32>
    %511 = arith.mulf %510, %497 : vector<8x4xf32>
    %512 = arith.addf %511, %15 : vector<8x4xf32>
    %513 = arith.addf %512, %503 : vector<8x4xf32>
    %514 = arith.select %11, %513, %509 : vector<8x4xi1>, vector<8x4xf32>
    %cst_105 = arith.constant 9.990000e-01 : f32
    %515 = vector.broadcast %cst_105 : f32 to vector<8x4xf32>
    %516 = arith.mulf %515, %500 : vector<8x4xf32>
    %517 = arith.mulf %513, %17 : vector<8x4xf32>
    %518 = arith.subf %516, %517 : vector<8x4xf32>
    %519 = arith.subf %518, %19 : vector<8x4xf32>
    %cst_106 = arith.constant 9.990000e-01 : f32
    %520 = vector.broadcast %cst_106 : f32 to vector<8x4xf32>
    %521 = arith.mulf %520, %514 : vector<8x4xf32>
    %522 = arith.subf %514, %513 : vector<8x4xf32>
    %523 = arith.mulf %522, %13 : vector<8x4xf32>
    %524 = arith.subf %521, %523 : vector<8x4xf32>
    %525 = arith.addf %524, %15 : vector<8x4xf32>
    %cst_107 = arith.constant 9.990000e-01 : f32
    %526 = vector.broadcast %cst_107 : f32 to vector<8x4xf32>
    %527 = arith.mulf %526, %513 : vector<8x4xf32>
    %528 = arith.addf %527, %15 : vector<8x4xf32>
    %529 = arith.addf %528, %519 : vector<8x4xf32>
    %530 = arith.select %11, %529, %525 : vector<8x4xi1>, vector<8x4xf32>
    %cst_108 = arith.constant 9.990000e-01 : f32
    %531 = vector.broadcast %cst_108 : f32 to vector<8x4xf32>
    %532 = arith.mulf %531, %516 : vector<8x4xf32>
    %533 = arith.mulf %529, %17 : vector<8x4xf32>
    %534 = arith.subf %532, %533 : vector<8x4xf32>
    %535 = arith.subf %534, %19 : vector<8x4xf32>
    %cst_109 = arith.constant 9.990000e-01 : f32
    %536 = vector.broadcast %cst_109 : f32 to vector<8x4xf32>
    %537 = arith.mulf %536, %530 : vector<8x4xf32>
    %538 = arith.subf %530, %529 : vector<8x4xf32>
    %539 = arith.mulf %538, %13 : vector<8x4xf32>
    %540 = arith.subf %537, %539 : vector<8x4xf32>
    %541 = arith.addf %540, %15 : vector<8x4xf32>
    %cst_110 = arith.constant 9.990000e-01 : f32
    %542 = vector.broadcast %cst_110 : f32 to vector<8x4xf32>
    %543 = arith.mulf %542, %529 : vector<8x4xf32>
    %544 = arith.addf %543, %15 : vector<8x4xf32>
    %545 = arith.addf %544, %535 : vector<8x4xf32>
    %546 = arith.select %11, %545, %541 : vector<8x4xi1>, vector<8x4xf32>
    %cst_111 = arith.constant 9.990000e-01 : f32
    %547 = vector.broadcast %cst_111 : f32 to vector<8x4xf32>
    %548 = arith.mulf %547, %532 : vector<8x4xf32>
    %549 = arith.mulf %545, %17 : vector<8x4xf32>
    %550 = arith.subf %548, %549 : vector<8x4xf32>
    %551 = arith.subf %550, %19 : vector<8x4xf32>
    %cst_112 = arith.constant 9.990000e-01 : f32
    %552 = vector.broadcast %cst_112 : f32 to vector<8x4xf32>
    %553 = arith.mulf %552, %546 : vector<8x4xf32>
    %554 = arith.subf %546, %545 : vector<8x4xf32>
    %555 = arith.mulf %554, %13 : vector<8x4xf32>
    %556 = arith.subf %553, %555 : vector<8x4xf32>
    %557 = arith.addf %556, %15 : vector<8x4xf32>
    %cst_113 = arith.constant 9.990000e-01 : f32
    %558 = vector.broadcast %cst_113 : f32 to vector<8x4xf32>
    %559 = arith.mulf %558, %545 : vector<8x4xf32>
    %560 = arith.addf %559, %15 : vector<8x4xf32>
    %561 = arith.addf %560, %551 : vector<8x4xf32>
    %562 = arith.select %11, %561, %557 : vector<8x4xi1>, vector<8x4xf32>
    %cst_114 = arith.constant 9.990000e-01 : f32
    %563 = vector.broadcast %cst_114 : f32 to vector<8x4xf32>
    %564 = arith.mulf %563, %548 : vector<8x4xf32>
    %565 = arith.mulf %561, %17 : vector<8x4xf32>
    %566 = arith.subf %564, %565 : vector<8x4xf32>
    %567 = arith.subf %566, %19 : vector<8x4xf32>
    %cst_115 = arith.constant 9.990000e-01 : f32
    %568 = vector.broadcast %cst_115 : f32 to vector<8x4xf32>
    %569 = arith.mulf %568, %562 : vector<8x4xf32>
    %570 = arith.subf %562, %561 : vector<8x4xf32>
    %571 = arith.mulf %570, %13 : vector<8x4xf32>
    %572 = arith.subf %569, %571 : vector<8x4xf32>
    %573 = arith.addf %572, %15 : vector<8x4xf32>
    %cst_116 = arith.constant 9.990000e-01 : f32
    %574 = vector.broadcast %cst_116 : f32 to vector<8x4xf32>
    %575 = arith.mulf %574, %561 : vector<8x4xf32>
    %576 = arith.addf %575, %15 : vector<8x4xf32>
    %577 = arith.addf %576, %567 : vector<8x4xf32>
    %578 = arith.select %11, %577, %573 : vector<8x4xi1>, vector<8x4xf32>
    %cst_117 = arith.constant 9.990000e-01 : f32
    %579 = vector.broadcast %cst_117 : f32 to vector<8x4xf32>
    %580 = arith.mulf %579, %564 : vector<8x4xf32>
    %581 = arith.mulf %577, %17 : vector<8x4xf32>
    %582 = arith.subf %580, %581 : vector<8x4xf32>
    %583 = arith.subf %582, %19 : vector<8x4xf32>
    %cst_118 = arith.constant 9.990000e-01 : f32
    %584 = vector.broadcast %cst_118 : f32 to vector<8x4xf32>
    %585 = arith.mulf %584, %578 : vector<8x4xf32>
    %586 = arith.subf %578, %577 : vector<8x4xf32>
    %587 = arith.mulf %586, %13 : vector<8x4xf32>
    %588 = arith.subf %585, %587 : vector<8x4xf32>
    %589 = arith.addf %588, %15 : vector<8x4xf32>
    %cst_119 = arith.constant 9.990000e-01 : f32
    %590 = vector.broadcast %cst_119 : f32 to vector<8x4xf32>
    %591 = arith.mulf %590, %577 : vector<8x4xf32>
    %592 = arith.addf %591, %15 : vector<8x4xf32>
    %593 = arith.addf %592, %583 : vector<8x4xf32>
    %594 = arith.select %11, %593, %589 : vector<8x4xi1>, vector<8x4xf32>
    %cst_120 = arith.constant 9.990000e-01 : f32
    %595 = vector.broadcast %cst_120 : f32 to vector<8x4xf32>
    %596 = arith.mulf %595, %580 : vector<8x4xf32>
    %597 = arith.mulf %593, %17 : vector<8x4xf32>
    %598 = arith.subf %596, %597 : vector<8x4xf32>
    %599 = arith.subf %598, %19 : vector<8x4xf32>
    %cst_121 = arith.constant 9.990000e-01 : f32
    %600 = vector.broadcast %cst_121 : f32 to vector<8x4xf32>
    %601 = arith.mulf %600, %594 : vector<8x4xf32>
    %602 = arith.subf %594, %593 : vector<8x4xf32>
    %603 = arith.mulf %602, %13 : vector<8x4xf32>
    %604 = arith.subf %601, %603 : vector<8x4xf32>
    %605 = arith.addf %604, %15 : vector<8x4xf32>
    %cst_122 = arith.constant 9.990000e-01 : f32
    %606 = vector.broadcast %cst_122 : f32 to vector<8x4xf32>
    %607 = arith.mulf %606, %593 : vector<8x4xf32>
    %608 = arith.addf %607, %15 : vector<8x4xf32>
    %609 = arith.addf %608, %599 : vector<8x4xf32>
    %610 = arith.select %11, %609, %605 : vector<8x4xi1>, vector<8x4xf32>
    %cst_123 = arith.constant 9.990000e-01 : f32
    %611 = vector.broadcast %cst_123 : f32 to vector<8x4xf32>
    %612 = arith.mulf %611, %596 : vector<8x4xf32>
    %613 = arith.mulf %609, %17 : vector<8x4xf32>
    %614 = arith.subf %612, %613 : vector<8x4xf32>
    %615 = arith.subf %614, %19 : vector<8x4xf32>
    %cst_124 = arith.constant 9.990000e-01 : f32
    %616 = vector.broadcast %cst_124 : f32 to vector<8x4xf32>
    %617 = arith.mulf %616, %610 : vector<8x4xf32>
    %618 = arith.subf %610, %609 : vector<8x4xf32>
    %619 = arith.mulf %618, %13 : vector<8x4xf32>
    %620 = arith.subf %617, %619 : vector<8x4xf32>
    %621 = arith.addf %620, %15 : vector<8x4xf32>
    %cst_125 = arith.constant 9.990000e-01 : f32
    %622 = vector.broadcast %cst_125 : f32 to vector<8x4xf32>
    %623 = arith.mulf %622, %609 : vector<8x4xf32>
    %624 = arith.addf %623, %15 : vector<8x4xf32>
    %625 = arith.addf %624, %615 : vector<8x4xf32>
    %626 = arith.select %11, %625, %621 : vector<8x4xi1>, vector<8x4xf32>
    %cst_126 = arith.constant 9.990000e-01 : f32
    %627 = vector.broadcast %cst_126 : f32 to vector<8x4xf32>
    %628 = arith.mulf %627, %612 : vector<8x4xf32>
    %629 = arith.mulf %625, %17 : vector<8x4xf32>
    %630 = arith.subf %628, %629 : vector<8x4xf32>
    %631 = arith.subf %630, %19 : vector<8x4xf32>
    %cst_127 = arith.constant 9.990000e-01 : f32
    %632 = vector.broadcast %cst_127 : f32 to vector<8x4xf32>
    %633 = arith.mulf %632, %626 : vector<8x4xf32>
    %634 = arith.subf %626, %625 : vector<8x4xf32>
    %635 = arith.mulf %634, %13 : vector<8x4xf32>
    %636 = arith.subf %633, %635 : vector<8x4xf32>
    %637 = arith.addf %636, %15 : vector<8x4xf32>
    %cst_128 = arith.constant 9.990000e-01 : f32
    %638 = vector.broadcast %cst_128 : f32 to vector<8x4xf32>
    %639 = arith.mulf %638, %625 : vector<8x4xf32>
    %640 = arith.addf %639, %15 : vector<8x4xf32>
    %641 = arith.addf %640, %631 : vector<8x4xf32>
    %642 = arith.select %11, %641, %637 : vector<8x4xi1>, vector<8x4xf32>
    %cst_129 = arith.constant 9.990000e-01 : f32
    %643 = vector.broadcast %cst_129 : f32 to vector<8x4xf32>
    %644 = arith.mulf %643, %628 : vector<8x4xf32>
    %645 = arith.subf %642, %641 : vector<8x4xf32>
    %cst_130 = arith.constant 5.000000e-01 : f32
    %646 = vector.broadcast %cst_130 : f32 to vector<8x4xf32>
    %647 = arith.mulf %646, %645 : vector<8x4xf32>
    %648 = arith.mulf %647, %1 : vector<8x4xf32>
    %649 = arith.subf %648, %3 : vector<8x4xf32>
    %650 = arith.mulf %645, %649 : vector<8x4xf32>
    %651 = arith.mulf %642, %642 : vector<8x4xf32>
    %cst_131 = arith.constant 5.000000e-02 : f32
    %652 = vector.broadcast %cst_131 : f32 to vector<8x4xf32>
    %653 = arith.mulf %652, %651 : vector<8x4xf32>
    %654 = arith.addf %650, %653 : vector<8x4xf32>
    %655 = vector.shape_cast %654 : vector<8x4xf32> to vector<1x8x4xf32>
    %cst_132 = arith.constant dense<0.000000e+00> : vector<1xf32>
    %656 = vector.multi_reduction <add>, %655, %cst_132 [1, 2] : vector<1x8x4xf32> to vector<1xf32>
    %657 = vector.shape_cast %656 : vector<1xf32> to vector<1x1x1xf32>
    %658 = vector.extract %657[0, 0, 0] : f32 from vector<1x1x1xf32>
    %659 = vector.broadcast %658 : f32 to vector<1x1xf32>
    %660 = arith.mulf %641, %17 : vector<8x4xf32>
    %661 = arith.subf %644, %660 : vector<8x4xf32>
    %662 = arith.subf %661, %19 : vector<8x4xf32>
    %cst_133 = arith.constant 9.990000e-01 : f32
    %663 = vector.broadcast %cst_133 : f32 to vector<8x4xf32>
    %664 = arith.mulf %663, %642 : vector<8x4xf32>
    %665 = arith.subf %642, %641 : vector<8x4xf32>
    %666 = arith.mulf %665, %13 : vector<8x4xf32>
    %667 = arith.subf %664, %666 : vector<8x4xf32>
    %668 = arith.addf %667, %15 : vector<8x4xf32>
    %cst_134 = arith.constant 9.990000e-01 : f32
    %669 = vector.broadcast %cst_134 : f32 to vector<8x4xf32>
    %670 = arith.mulf %669, %641 : vector<8x4xf32>
    %671 = arith.addf %670, %15 : vector<8x4xf32>
    %672 = arith.addf %671, %662 : vector<8x4xf32>
    %673 = arith.select %11, %672, %668 : vector<8x4xi1>, vector<8x4xf32>
    %c0_135 = arith.constant 0 : index
    %c0_136 = arith.constant 0 : index
    %674 = vector.load %arg3[%c0_135, %c0_136] : memref<8x4xf32, #tpu.memory_space<vmem>>, vector<8x4xf32>
    tpu.vector_store %arg3[%c0_135, %c0_136], %673 {strides = array<i32>} : memref<8x4xf32, #tpu.memory_space<vmem>>, vector<8x4xf32>,
    %c0_137 = arith.constant 0 : index
    %c0_138 = arith.constant 0 : index
    %675 = vector.load %arg4[%c0_137, %c0_138] : memref<1x1xf32, #tpu.memory_space<vmem>>, vector<1x1xf32>
    tpu.vector_store %arg4[%c0_137, %c0_138], %659 {strides = array<i32>} : memref<1x1xf32, #tpu.memory_space<vmem>>, vector<1x1xf32>,
    return
  }
  func.func @transform_0(%arg0: i32) -> (i32, i32, i32) {
    %c0_i32 = arith.constant 0 : i32
    %c0_i32_0 = arith.constant 0 : i32
    %c0_i32_1 = arith.constant 0 : i32
    %c0_i32_2 = arith.constant 0 : i32
    return %c0_i32, %c0_i32_0, %c0_i32_1 : i32, i32, i32
  }
  func.func @transform_1(%arg0: i32) -> (i32, i32) {
    %c0_i32 = arith.constant 0 : i32
    %c0_i32_0 = arith.constant 0 : i32
    %c0_i32_1 = arith.constant 0 : i32
    return %c0_i32, %c0_i32_0 : i32, i32
  }
  func.func @transform_2(%arg0: i32) -> (i32, i32) {
    %c0_i32 = arith.constant 0 : i32
    %c0_i32_0 = arith.constant 0 : i32
    %c0_i32_1 = arith.constant 0 : i32
    return %c0_i32, %c0_i32_0 : i32, i32
  }
  func.func @transform_3(%arg0: i32) -> (i32, i32) {
    %c0_i32 = arith.constant 0 : i32
    %c0_i32_0 = arith.constant 0 : i32
    %c0_i32_1 = arith.constant 0 : i32
    return %c0_i32, %c0_i32_0 : i32, i32
  }
}

</mosaic_0001>

<bundles_post_ra>
// kernel: tile.8
= control target key start
LH: loop header
LB: loop body
LE: loop exit
PB: predicated region body
PF: predicated region fallthrough
CT: control target
= control target key end

     0   :  { %s22_s0 = inlined_call_operand.vmem [shape: f32[2], index: 0, kind: input, shape index: {}]   ;;  %s23_s1 = inlined_call_operand.vmem [shape: f32[2,2], index: 1, kind: output, shape index: {}]  }
   0x1   :  { %v4_v0 = vld [vmem:[%s22_s0] ss:$0 sm:$0xff] }
   0x2   :  { %5 = vst [vmem:[%s23_s1] sm:$0x3] %v4_v0 }

// kernel: mpc_pallas.1
= control target key start
LH: loop header
LB: loop body
LE: loop exit
PB: predicated region body
PF: predicated region fallthrough
CT: control target
= control target key end

     0   :  { %9 = vsyncpa [#allocation3], 0  ;;  %v22_v6 = vlaneseq  ;;  %vm545_vm1 = vcmask 31744   ;;  %s621_s26 = smov [#allocation2]   ;;  %vm569_vm2 = vcmask 0   ;;  %s974_s0 = inlined_call_operand.vmem [shape: f32[4,8,4], index: 0, kind: input, shape index: {}]   ;;  %s975_s1 = inlined_call_operand.vmem [shape: f32[8,4], index: 1, kind: input, shape index: {}]   ;;  %s976_s2 = inlined_call_operand.vmem [shape: f32[8,4], index: 2, kind: output, shape index: {0}]   ;;  %s977_s3 = inlined_call_operand.hbm [shape: f32[1,1], index: 3, kind: output, shape index: {1}]  }
   0x1   :  { %v14_v0 = vld [vmem:[%s974_s0] sm:$0xff]  ;;  %v589_v1 = vld [vmem:[%s974_s0 + $0x8] sm:$0xff]  ;;  %v590_v2 = vld [vmem:[%s974_s0 + $0x10] sm:$0xff]  ;;  %s579_s27 = sshll.u32 %s621_s26, 4  ;;  %s580_s27 = int_to_ptr.vmem [resolvable:$true] %s579_s27 }
   0x2   :  { %v591_v3 = vld [vmem:[%s974_s0 + $0x18] sm:$0xff]  ;;  %v21_v4 = vld [vmem:[%s975_s1] sm:$0xff]  ;;  %v657_v5 = vmul.f32 0.01, %v14_v0  ;;  %v659_v7 = vmul.f32 0.01, %v589_v1  ;;  %p602_p1 = scmp.lt.s32.totalorder %s580_s27, %s580_s27 }
   0x3   :  { %v33_v8 = vmul.f32 0.999, %v21_v4  ;;  %v34_v9 = vsub.f32 %v21_v4, %v591_v3  ;;  %v38_v12 = vmul.f32 0.999, %v591_v3  ;;  %v670_v16 = vshrl.u32 %v22_v6, 7  ;;  %s597_s29 = scalar_lea.vmem %s580_s27, 16 }
   0x4   :  { %v662_v10 = vmul.f32 8.0, %v657_v5  ;;  %v29_v11 = vmul.f32 %v590_v2, %v657_v5  ;;  %v667_v14 = vmul.f32 8.0, %v659_v7  ;;  %p598_p0 = scmp.ne.s32.totalorder %s580_s27, %s597_s29  ;;  %s601_s30 = scalar_lea.vmem %s580_s27, 32 }
   0x5   :  { %v35_v13 = vmul.f32 %v34_v9, %v657_v5  ;;  %v39_v19 = vadd.f32 %v38_v12, %v659_v7  ;;  %vm24_vm0 = vcmp.eq.s32.totalorder %v670_v16, 0  ;;  %p603_p2 = scmp.lt.s32.totalorder %s601_s30, %s597_s29 }
   0x6   :  { %v30_v15 = vmul.f32 %v591_v3, %v662_v10  ;;  %v42_v23 = vmul.f32 0.999, %v29_v11 }
   0x7   :  { %v36_v17 = vsub.f32 %v33_v8, %v35_v13  ;;  %p604_p3 = por %p603_p2, %p602_p1 }
   0x8   :  { %v31_v18 = vsub.f32 %v29_v11, %v30_v15  ;;  %v55_v35 = vmul.f32 0.999, %v42_v23 }
   0x9   :  { %v37_v21 = vadd.f32 %v36_v17, %v659_v7  ;;  %p605_p4 = pnand %p604_p3, %p598_p0 }
   0xa   :  { %v32_v20 = vsub.f32 %v31_v18, %v667_v14  ;;  %v68_v48 = vmul.f32 0.999, %v55_v35 }
   0xc   :  { %v40_v22 = vadd.f32 %v39_v19, %v32_v20  ;;  %v81_v60 = vmul.f32 0.999, %v68_v48 }
   0xe   :  { %v41_v24 = vsel %vm24_vm0, %v40_v22, %v37_v21  ;;  %v43_v25 = vmul.f32 %v40_v22, %v662_v10  ;;  %v51_v26 = vmul.f32 0.999, %v40_v22  ;;  %v94_v12 = vmul.f32 0.999, %v81_v60 }
   0xf   :  { %v46_v27 = vmul.f32 0.999, %v41_v24  ;;  %v47_v28 = vsub.f32 %v41_v24, %v40_v22 }
  0x10   :  { %v44_v29 = vsub.f32 %v42_v23, %v43_v25  ;;  %v52_v30 = vadd.f32 %v51_v26, %v659_v7  ;;  %v107_v26 = vmul.f32 0.999, %v94_v12 }
  0x11   :  { %v48_v31 = vmul.f32 %v47_v28, %v657_v5 }
  0x12   :  { %v45_v32 = vsub.f32 %v44_v29, %v667_v14 }
  0x13   :  { %v49_v33 = vsub.f32 %v46_v27, %v48_v31 }
  0x14   :  { %v53_v34 = vadd.f32 %v52_v30, %v45_v32 }
  0x15   :  { %v50_v36 = vadd.f32 %v49_v33, %v659_v7 }
  0x16   :  { %v56_v37 = vmul.f32 %v53_v34, %v662_v10  ;;  %v64_v38 = vmul.f32 0.999, %v53_v34 }
  0x17   :  { %v54_v39 = vsel %vm24_vm0, %v53_v34, %v50_v36 }
  0x18   :  { %v57_v40 = vsub.f32 %v55_v35, %v56_v37  ;;  %v59_v41 = vmul.f32 0.999, %v54_v39  ;;  %v60_v42 = vsub.f32 %v54_v39, %v53_v34  ;;  %v65_v43 = vadd.f32 %v64_v38, %v659_v7 }
  0x19   :  { %v120_v39 = vmul.f32 0.999, %v107_v26 }
  0x1a   :  { %v58_v44 = vsub.f32 %v57_v40, %v667_v14  ;;  %v61_v45 = vmul.f32 %v60_v42, %v657_v5 }
  0x1c   :  { %v62_v46 = vsub.f32 %v59_v41, %v61_v45  ;;  %v66_v47 = vadd.f32 %v65_v43, %v58_v44 }
  0x1e   :  { %v63_v49 = vadd.f32 %v62_v46, %v659_v7  ;;  %v69_v50 = vmul.f32 %v66_v47, %v662_v10  ;;  %v77_v51 = vmul.f32 0.999, %v66_v47 }
  0x20   :  { %v67_v52 = vsel %vm24_vm0, %v66_v47, %v63_v49  ;;  %v70_v53 = vsub.f32 %v68_v48, %v69_v50  ;;  %v78_v54 = vadd.f32 %v77_v51, %v659_v7  ;;  %v133_v50 = vmul.f32 0.999, %v120_v39 }
  0x21   :  { %v72_v55 = vmul.f32 0.999, %v67_v52  ;;  %v73_v56 = vsub.f32 %v67_v52, %v66_v47 }
  0x22   :  { %v71_v57 = vsub.f32 %v70_v53, %v667_v14 }
  0x23   :  { %v74_v58 = vmul.f32 %v73_v56, %v657_v5 }
  0x24   :  { %v79_v59 = vadd.f32 %v78_v54, %v71_v57 }
  0x25   :  { %v75_v61 = vsub.f32 %v72_v55, %v74_v58 }
  0x26   :  { %v82_v62 = vmul.f32 %v79_v59, %v662_v10  ;;  %v90_v63 = vmul.f32 0.999, %v79_v59 }
  0x27   :  { %v76_v0 = vadd.f32 %v75_v61, %v659_v7 }
  0x28   :  { %v83_v1 = vsub.f32 %v81_v60, %v82_v62  ;;  %v91_v2 = vadd.f32 %v90_v63, %v659_v7  ;;  %v146_v62 = vmul.f32 0.999, %v133_v50 }
  0x29   :  { %v80_v3 = vsel %vm24_vm0, %v79_v59, %v76_v0 }
  0x2a   :  { %v84_v4 = vsub.f32 %v83_v1, %v667_v14  ;;  %v85_v6 = vmul.f32 0.999, %v80_v3  ;;  %v86_v8 = vsub.f32 %v80_v3, %v79_v59 }
  0x2c   :  { %v87_v9 = vmul.f32 %v86_v8, %v657_v5  ;;  %v92_v11 = vadd.f32 %v91_v2, %v84_v4 }
  0x2e   :  { %v88_v13 = vsub.f32 %v85_v6, %v87_v9  ;;  %v95_v15 = vmul.f32 %v92_v11, %v662_v10  ;;  %v103_v17 = vmul.f32 0.999, %v92_v11 }
  0x30   :  { %v89_v18 = vadd.f32 %v88_v13, %v659_v7  ;;  %v96_v19 = vsub.f32 %v94_v12, %v95_v15  ;;  %v104_v20 = vadd.f32 %v103_v17, %v659_v7  ;;  %v159_v15 = vmul.f32 0.999, %v146_v62 }
  0x32   :  { %v93_v21 = vsel %vm24_vm0, %v92_v11, %v89_v18  ;;  %v97_v22 = vsub.f32 %v96_v19, %v667_v14 }
  0x33   :  { %v98_v23 = vmul.f32 0.999, %v93_v21  ;;  %v99_v24 = vsub.f32 %v93_v21, %v92_v11 }
  0x34   :  { %v105_v25 = vadd.f32 %v104_v20, %v97_v22 }
  0x35   :  { %v100_v27 = vmul.f32 %v99_v24, %v657_v5 }
  0x36   :  { %v108_v28 = vmul.f32 %v105_v25, %v662_v10  ;;  %v116_v29 = vmul.f32 0.999, %v105_v25 }
  0x37   :  { %v101_v30 = vsub.f32 %v98_v23, %v100_v27 }
  0x38   :  { %v109_v31 = vsub.f32 %v107_v26, %v108_v28  ;;  %v117_v32 = vadd.f32 %v116_v29, %v659_v7  ;;  %v172_v28 = vmul.f32 0.999, %v159_v15 }
  0x39   :  { %v102_v33 = vadd.f32 %v101_v30, %v659_v7 }
  0x3a   :  { %v110_v34 = vsub.f32 %v109_v31, %v667_v14 }
  0x3b   :  { %v106_v35 = vsel %vm24_vm0, %v105_v25, %v102_v33 }
  0x3c   :  { %v111_v36 = vmul.f32 0.999, %v106_v35  ;;  %v112_v37 = vsub.f32 %v106_v35, %v105_v25  ;;  %v118_v38 = vadd.f32 %v117_v32, %v110_v34 }
  0x3e   :  { %v113_v40 = vmul.f32 %v112_v37, %v657_v5  ;;  %v121_v41 = vmul.f32 %v118_v38, %v662_v10  ;;  %v129_v42 = vmul.f32 0.999, %v118_v38 }
  0x40   :  { %v114_v43 = vsub.f32 %v111_v36, %v113_v40  ;;  %v122_v44 = vsub.f32 %v120_v39, %v121_v41  ;;  %v130_v45 = vadd.f32 %v129_v42, %v659_v7  ;;  %v185_v41 = vmul.f32 0.999, %v172_v28 }
  0x42   :  { %v115_v46 = vadd.f32 %v114_v43, %v659_v7  ;;  %v123_v47 = vsub.f32 %v122_v44, %v667_v14 }
  0x44   :  { %v119_v48 = vsel %vm24_vm0, %v118_v38, %v115_v46  ;;  %v131_v49 = vadd.f32 %v130_v45, %v123_v47 }
  0x45   :  { %v124_v51 = vmul.f32 0.999, %v119_v48  ;;  %v125_v52 = vsub.f32 %v119_v48, %v118_v38 }
  0x46   :  { %v134_v53 = vmul.f32 %v131_v49, %v662_v10  ;;  %v142_v54 = vmul.f32 0.999, %v131_v49 }
  0x47   :  { %v126_v55 = vmul.f32 %v125_v52, %v657_v5 }
  0x48   :  { %v135_v56 = vsub.f32 %v133_v50, %v134_v53  ;;  %v143_v57 = vadd.f32 %v142_v54, %v659_v7  ;;  %v198_v53 = vmul.f32 0.999, %v185_v41 }
  0x49   :  { %v127_v58 = vsub.f32 %v124_v51, %v126_v55 }
  0x4a   :  { %v136_v59 = vsub.f32 %v135_v56, %v667_v14 }
  0x4b   :  { %v128_v60 = vadd.f32 %v127_v58, %v659_v7 }
  0x4c   :  { %v144_v61 = vadd.f32 %v143_v57, %v136_v59 }
  0x4d   :  { %v132_v63 = vsel %vm24_vm0, %v131_v49, %v128_v60 }
  0x4e   :  { %v137_v0 = vmul.f32 0.999, %v132_v63  ;;  %v138_v1 = vsub.f32 %v132_v63, %v131_v49  ;;  %v147_v2 = vmul.f32 %v144_v61, %v662_v10  ;;  %v155_v3 = vmul.f32 0.999, %v144_v61 }
  0x50   :  { %v139_v4 = vmul.f32 %v138_v1, %v657_v5  ;;  %v148_v6 = vsub.f32 %v146_v62, %v147_v2  ;;  %v156_v8 = vadd.f32 %v155_v3, %v659_v7  ;;  %v211_v2 = vmul.f32 0.999, %v198_v53 }
  0x52   :  { %v140_v9 = vsub.f32 %v137_v0, %v139_v4  ;;  %v149_v11 = vsub.f32 %v148_v6, %v667_v14 }
  0x54   :  { %v141_v12 = vadd.f32 %v140_v9, %v659_v7  ;;  %v157_v13 = vadd.f32 %v156_v8, %v149_v11 }
  0x56   :  { %v145_v17 = vsel %vm24_vm0, %v144_v61, %v141_v12  ;;  %v160_v18 = vmul.f32 %v157_v13, %v662_v10  ;;  %v168_v19 = vmul.f32 0.999, %v157_v13 }
  0x57   :  { %v150_v20 = vmul.f32 0.999, %v145_v17  ;;  %v151_v21 = vsub.f32 %v145_v17, %v144_v61 }
  0x58   :  { %v161_v22 = vsub.f32 %v159_v15, %v160_v18  ;;  %v169_v23 = vadd.f32 %v168_v19, %v659_v7  ;;  %v224_v19 = vmul.f32 0.999, %v211_v2 }
  0x59   :  { %v152_v24 = vmul.f32 %v151_v21, %v657_v5 }
  0x5a   :  { %v162_v25 = vsub.f32 %v161_v22, %v667_v14 }
  0x5b   :  { %v153_v26 = vsub.f32 %v150_v20, %v152_v24 }
  0x5c   :  { %v170_v27 = vadd.f32 %v169_v23, %v162_v25 }
  0x5d   :  { %v154_v29 = vadd.f32 %v153_v26, %v659_v7 }
  0x5e   :  { %v173_v30 = vmul.f32 %v170_v27, %v662_v10  ;;  %v181_v31 = vmul.f32 0.999, %v170_v27 }
  0x5f   :  { %v158_v32 = vsel %vm24_vm0, %v157_v13, %v154_v29 }
  0x60   :  { %v163_v33 = vmul.f32 0.999, %v158_v32  ;;  %v164_v34 = vsub.f32 %v158_v32, %v157_v13  ;;  %v174_v35 = vsub.f32 %v172_v28, %v173_v30  ;;  %v182_v36 = vadd.f32 %v181_v31, %v659_v7 }
  0x61   :  { %v237_v32 = vmul.f32 0.999, %v224_v19 }
  0x62   :  { %v165_v37 = vmul.f32 %v164_v34, %v657_v5  ;;  %v175_v38 = vsub.f32 %v174_v35, %v667_v14 }
  0x64   :  { %v166_v39 = vsub.f32 %v163_v33, %v165_v37  ;;  %v183_v40 = vadd.f32 %v182_v36, %v175_v38 }
  0x66   :  { %v167_v42 = vadd.f32 %v166_v39, %v659_v7  ;;  %v186_v43 = vmul.f32 %v183_v40, %v662_v10  ;;  %v194_v44 = vmul.f32 0.999, %v183_v40 }
  0x68   :  { %v171_v45 = vsel %vm24_vm0, %v170_v27, %v167_v42  ;;  %v187_v46 = vsub.f32 %v185_v41, %v186_v43  ;;  %v195_v47 = vadd.f32 %v194_v44, %v659_v7  ;;  %v250_v43 = vmul.f32 0.999, %v237_v32 }
  0x69   :  { %v176_v48 = vmul.f32 0.999, %v171_v45  ;;  %v177_v49 = vsub.f32 %v171_v45, %v170_v27 }
  0x6a   :  { %v188_v50 = vsub.f32 %v187_v46, %v667_v14 }
  0x6b   :  { %v178_v51 = vmul.f32 %v177_v49, %v657_v5 }
  0x6c   :  { %v196_v52 = vadd.f32 %v195_v47, %v188_v50 }
  0x6d   :  { %v179_v54 = vsub.f32 %v176_v48, %v178_v51 }
  0x6e   :  { %v199_v55 = vmul.f32 %v196_v52, %v662_v10  ;;  %v207_v56 = vmul.f32 0.999, %v196_v52 }
  0x6f   :  { %v180_v57 = vadd.f32 %v179_v54, %v659_v7 }
  0x70   :  { %v200_v58 = vsub.f32 %v198_v53, %v199_v55  ;;  %v208_v59 = vadd.f32 %v207_v56, %v659_v7  ;;  %v263_v55 = vmul.f32 0.999, %v250_v43 }
  0x71   :  { %v184_v60 = vsel %vm24_vm0, %v183_v40, %v180_v57 }
  0x72   :  { %v189_v61 = vmul.f32 0.999, %v184_v60  ;;  %v190_v62 = vsub.f32 %v184_v60, %v183_v40  ;;  %v201_v63 = vsub.f32 %v200_v58, %v667_v14 }
  0x74   :  { %v191_v0 = vmul.f32 %v190_v62, %v657_v5  ;;  %v209_v1 = vadd.f32 %v208_v59, %v201_v63 }
  0x76   :  { %v192_v3 = vsub.f32 %v189_v61, %v191_v0  ;;  %v212_v4 = vmul.f32 %v209_v1, %v662_v10  ;;  %v220_v6 = vmul.f32 0.999, %v209_v1 }
  0x78   :  { %v193_v8 = vadd.f32 %v192_v3, %v659_v7  ;;  %v213_v9 = vsub.f32 %v211_v2, %v212_v4  ;;  %v221_v11 = vadd.f32 %v220_v6, %v659_v7  ;;  %v276_v4 = vmul.f32 0.999, %v263_v55 }
  0x7a   :  { %v197_v12 = vsel %vm24_vm0, %v196_v52, %v193_v8  ;;  %v214_v13 = vsub.f32 %v213_v9, %v667_v14 }
  0x7b   :  { %v202_v15 = vmul.f32 0.999, %v197_v12  ;;  %v203_v17 = vsub.f32 %v197_v12, %v196_v52 }
  0x7c   :  { %v222_v18 = vadd.f32 %v221_v11, %v214_v13 }
  0x7d   :  { %v204_v20 = vmul.f32 %v203_v17, %v657_v5 }
  0x7e   :  { %v225_v21 = vmul.f32 %v222_v18, %v662_v10  ;;  %v233_v22 = vmul.f32 0.999, %v222_v18 }
  0x7f   :  { %v205_v23 = vsub.f32 %v202_v15, %v204_v20 }
  0x80   :  { %v226_v24 = vsub.f32 %v224_v19, %v225_v21  ;;  %v234_v25 = vadd.f32 %v233_v22, %v659_v7  ;;  %v289_v21 = vmul.f32 0.999, %v276_v4 }
  0x81   :  { %v206_v26 = vadd.f32 %v205_v23, %v659_v7 }
  0x82   :  { %v227_v27 = vsub.f32 %v226_v24, %v667_v14 }
  0x83   :  { %v210_v28 = vsel %vm24_vm0, %v209_v1, %v206_v26 }
  0x84   :  { %v215_v29 = vmul.f32 0.999, %v210_v28  ;;  %v216_v30 = vsub.f32 %v210_v28, %v209_v1  ;;  %v235_v31 = vadd.f32 %v234_v25, %v227_v27 }
  0x86   :  { %v217_v33 = vmul.f32 %v216_v30, %v657_v5  ;;  %v238_v34 = vmul.f32 %v235_v31, %v662_v10  ;;  %v246_v35 = vmul.f32 0.999, %v235_v31 }
  0x88   :  { %v218_v36 = vsub.f32 %v215_v29, %v217_v33  ;;  %v239_v37 = vsub.f32 %v237_v32, %v238_v34  ;;  %v247_v38 = vadd.f32 %v246_v35, %v659_v7  ;;  %v302_v34 = vmul.f32 0.999, %v289_v21 }
  0x8a   :  { %v219_v39 = vadd.f32 %v218_v36, %v659_v7  ;;  %v240_v40 = vsub.f32 %v239_v37, %v667_v14 }
  0x8c   :  { %v223_v41 = vsel %vm24_vm0, %v222_v18, %v219_v39  ;;  %v248_v42 = vadd.f32 %v247_v38, %v240_v40 }
  0x8d   :  { %v228_v44 = vmul.f32 0.999, %v223_v41  ;;  %v229_v45 = vsub.f32 %v223_v41, %v222_v18 }
  0x8e   :  { %v251_v46 = vmul.f32 %v248_v42, %v662_v10  ;;  %v259_v47 = vmul.f32 0.999, %v248_v42 }
  0x8f   :  { %v230_v48 = vmul.f32 %v229_v45, %v657_v5 }
  0x90   :  { %v252_v49 = vsub.f32 %v250_v43, %v251_v46  ;;  %v260_v50 = vadd.f32 %v259_v47, %v659_v7  ;;  %v315_v46 = vmul.f32 0.999, %v302_v34 }
  0x91   :  { %v231_v51 = vsub.f32 %v228_v44, %v230_v48 }
  0x92   :  { %v253_v52 = vsub.f32 %v252_v49, %v667_v14 }
  0x93   :  { %v232_v53 = vadd.f32 %v231_v51, %v659_v7 }
  0x94   :  { %v261_v54 = vadd.f32 %v260_v50, %v253_v52 }
  0x95   :  { %v236_v56 = vsel %vm24_vm0, %v235_v31, %v232_v53 }
  0x96   :  { %v241_v57 = vmul.f32 0.999, %v236_v56  ;;  %v242_v58 = vsub.f32 %v236_v56, %v235_v31  ;;  %v264_v59 = vmul.f32 %v261_v54, %v662_v10  ;;  %v272_v60 = vmul.f32 0.999, %v261_v54 }
  0x98   :  { %v243_v61 = vmul.f32 %v242_v58, %v657_v5  ;;  %v265_v62 = vsub.f32 %v263_v55, %v264_v59  ;;  %v273_v63 = vadd.f32 %v272_v60, %v659_v7  ;;  %v328_v59 = vmul.f32 0.999, %v315_v46 }
  0x9a   :  { %v244_v0 = vsub.f32 %v241_v57, %v243_v61  ;;  %v266_v1 = vsub.f32 %v265_v62, %v667_v14 }
  0x9c   :  { %v245_v2 = vadd.f32 %v244_v0, %v659_v7  ;;  %v274_v3 = vadd.f32 %v273_v63, %v266_v1 }
  0x9e   :  { %v249_v6 = vsel %vm24_vm0, %v248_v42, %v245_v2  ;;  %v277_v8 = vmul.f32 %v274_v3, %v662_v10  ;;  %v285_v9 = vmul.f32 0.999, %v274_v3 }
  0x9f   :  { %v254_v11 = vmul.f32 0.999, %v249_v6  ;;  %v255_v12 = vsub.f32 %v249_v6, %v248_v42 }
  0xa0   :  { %v278_v13 = vsub.f32 %v276_v4, %v277_v8  ;;  %v286_v15 = vadd.f32 %v285_v9, %v659_v7  ;;  %v341_v9 = vmul.f32 0.999, %v328_v59 }
  0xa1   :  { %v256_v17 = vmul.f32 %v255_v12, %v657_v5 }
  0xa2   :  { %v279_v18 = vsub.f32 %v278_v13, %v667_v14 }
  0xa3   :  { %v257_v19 = vsub.f32 %v254_v11, %v256_v17 }
  0xa4   :  { %v287_v20 = vadd.f32 %v286_v15, %v279_v18 }
  0xa5   :  { %v258_v22 = vadd.f32 %v257_v19, %v659_v7 }
  0xa6   :  { %v290_v23 = vmul.f32 %v287_v20, %v662_v10  ;;  %v298_v24 = vmul.f32 0.999, %v287_v20 }
  0xa7   :  { %v262_v25 = vsel %vm24_vm0, %v261_v54, %v258_v22 }
  0xa8   :  { %v267_v26 = vmul.f32 0.999, %v262_v25  ;;  %v268_v27 = vsub.f32 %v262_v25, %v261_v54  ;;  %v291_v28 = vsub.f32 %v289_v21, %v290_v23  ;;  %v299_v29 = vadd.f32 %v298_v24, %v659_v7 }
  0xa9   :  { %v354_v25 = vmul.f32 0.999, %v341_v9 }
  0xaa   :  { %v269_v30 = vmul.f32 %v268_v27, %v657_v5  ;;  %v292_v31 = vsub.f32 %v291_v28, %v667_v14 }
  0xac   :  { %v270_v32 = vsub.f32 %v267_v26, %v269_v30  ;;  %v300_v33 = vadd.f32 %v299_v29, %v292_v31 }
  0xae   :  { %v271_v35 = vadd.f32 %v270_v32, %v659_v7  ;;  %v303_v36 = vmul.f32 %v300_v33, %v662_v10  ;;  %v311_v37 = vmul.f32 0.999, %v300_v33 }
  0xb0   :  { %v275_v38 = vsel %vm24_vm0, %v274_v3, %v271_v35  ;;  %v304_v39 = vsub.f32 %v302_v34, %v303_v36  ;;  %v312_v40 = vadd.f32 %v311_v37, %v659_v7  ;;  %v367_v36 = vmul.f32 0.999, %v354_v25 }
  0xb1   :  { %v280_v41 = vmul.f32 0.999, %v275_v38  ;;  %v281_v42 = vsub.f32 %v275_v38, %v274_v3 }
  0xb2   :  { %v305_v43 = vsub.f32 %v304_v39, %v667_v14 }
  0xb3   :  { %v282_v44 = vmul.f32 %v281_v42, %v657_v5 }
  0xb4   :  { %v313_v45 = vadd.f32 %v312_v40, %v305_v43 }
  0xb5   :  { %v283_v47 = vsub.f32 %v280_v41, %v282_v44 }
  0xb6   :  { %v316_v48 = vmul.f32 %v313_v45, %v662_v10  ;;  %v324_v49 = vmul.f32 0.999, %v313_v45 }
  0xb7   :  { %v284_v50 = vadd.f32 %v283_v47, %v659_v7 }
  0xb8   :  { %v317_v51 = vsub.f32 %v315_v46, %v316_v48  ;;  %v325_v52 = vadd.f32 %v324_v49, %v659_v7  ;;  %v380_v48 = vmul.f32 0.999, %v367_v36 }
  0xb9   :  { %v288_v53 = vsel %vm24_vm0, %v287_v20, %v284_v50 }
  0xba   :  { %v293_v54 = vmul.f32 0.999, %v288_v53  ;;  %v294_v55 = vsub.f32 %v288_v53, %v287_v20  ;;  %v318_v56 = vsub.f32 %v317_v51, %v667_v14 }
  0xbc   :  { %v295_v57 = vmul.f32 %v294_v55, %v657_v5  ;;  %v326_v58 = vadd.f32 %v325_v52, %v318_v56 }
  0xbe   :  { %v296_v60 = vsub.f32 %v293_v54, %v295_v57  ;;  %v329_v61 = vmul.f32 %v326_v58, %v662_v10  ;;  %v337_v62 = vmul.f32 0.999, %v326_v58 }
  0xc0   :  { %v297_v63 = vadd.f32 %v296_v60, %v659_v7  ;;  %v330_v0 = vsub.f32 %v328_v59, %v329_v61  ;;  %v338_v1 = vadd.f32 %v337_v62, %v659_v7  ;;  %v393_v61 = vmul.f32 0.999, %v380_v48 }
  0xc2   :  { %v301_v2 = vsel %vm24_vm0, %v300_v33, %v297_v63  ;;  %v331_v3 = vsub.f32 %v330_v0, %v667_v14 }
  0xc3   :  { %v306_v4 = vmul.f32 0.999, %v301_v2  ;;  %v307_v6 = vsub.f32 %v301_v2, %v300_v33 }
  0xc4   :  { %v339_v8 = vadd.f32 %v338_v1, %v331_v3 }
  0xc5   :  { %v308_v11 = vmul.f32 %v307_v6, %v657_v5 }
  0xc6   :  { %v342_v12 = vmul.f32 %v339_v8, %v662_v10  ;;  %v350_v13 = vmul.f32 0.999, %v339_v8 }
  0xc7   :  { %v309_v15 = vsub.f32 %v306_v4, %v308_v11 }
  0xc8   :  { %v343_v17 = vsub.f32 %v341_v9, %v342_v12  ;;  %v351_v18 = vadd.f32 %v350_v13, %v659_v7  ;;  %v406_v12 = vmul.f32 0.999, %v393_v61 }
  0xc9   :  { %v310_v19 = vadd.f32 %v309_v15, %v659_v7 }
  0xca   :  { %v344_v20 = vsub.f32 %v343_v17, %v667_v14 }
  0xcb   :  { %v314_v21 = vsel %vm24_vm0, %v313_v45, %v310_v19 }
  0xcc   :  { %v319_v22 = vmul.f32 0.999, %v314_v21  ;;  %v320_v23 = vsub.f32 %v314_v21, %v313_v45  ;;  %v352_v24 = vadd.f32 %v351_v18, %v344_v20 }
  0xce   :  { %v321_v26 = vmul.f32 %v320_v23, %v657_v5  ;;  %v355_v27 = vmul.f32 %v352_v24, %v662_v10  ;;  %v363_v28 = vmul.f32 0.999, %v352_v24 }
  0xd0   :  { %v322_v29 = vsub.f32 %v319_v22, %v321_v26  ;;  %v356_v30 = vsub.f32 %v354_v25, %v355_v27  ;;  %v364_v31 = vadd.f32 %v363_v28, %v659_v7  ;;  %v419_v27 = vmul.f32 0.999, %v406_v12 }
  0xd2   :  { %v323_v32 = vadd.f32 %v322_v29, %v659_v7  ;;  %v357_v33 = vsub.f32 %v356_v30, %v667_v14 }
  0xd4   :  { %v327_v34 = vsel %vm24_vm0, %v326_v58, %v323_v32  ;;  %v365_v35 = vadd.f32 %v364_v31, %v357_v33 }
  0xd5   :  { %v332_v37 = vmul.f32 0.999, %v327_v34  ;;  %v333_v38 = vsub.f32 %v327_v34, %v326_v58 }
  0xd6   :  { %v368_v39 = vmul.f32 %v365_v35, %v662_v10  ;;  %v376_v40 = vmul.f32 0.999, %v365_v35 }
  0xd7   :  { %v334_v41 = vmul.f32 %v333_v38, %v657_v5 }
  0xd8   :  { %v369_v42 = vsub.f32 %v367_v36, %v368_v39  ;;  %v377_v43 = vadd.f32 %v376_v40, %v659_v7  ;;  %v432_v39 = vmul.f32 0.999, %v419_v27 }
  0xd9   :  { %v335_v44 = vsub.f32 %v332_v37, %v334_v41 }
  0xda   :  { %v370_v45 = vsub.f32 %v369_v42, %v667_v14 }
  0xdb   :  { %v336_v46 = vadd.f32 %v335_v44, %v659_v7 }
  0xdc   :  { %v378_v47 = vadd.f32 %v377_v43, %v370_v45 }
  0xdd   :  { %v340_v49 = vsel %vm24_vm0, %v339_v8, %v336_v46 }
  0xde   :  { %v345_v50 = vmul.f32 0.999, %v340_v49  ;;  %v346_v51 = vsub.f32 %v340_v49, %v339_v8  ;;  %v381_v52 = vmul.f32 %v378_v47, %v662_v10  ;;  %v389_v53 = vmul.f32 0.999, %v378_v47 }
  0xe0   :  { %v347_v54 = vmul.f32 %v346_v51, %v657_v5  ;;  %v382_v55 = vsub.f32 %v380_v48, %v381_v52  ;;  %v390_v56 = vadd.f32 %v389_v53, %v659_v7  ;;  %v445_v52 = vmul.f32 0.999, %v432_v39 }
  0xe2   :  { %v348_v57 = vsub.f32 %v345_v50, %v347_v54  ;;  %v383_v58 = vsub.f32 %v382_v55, %v667_v14 }
  0xe4   :  { %v349_v59 = vadd.f32 %v348_v57, %v659_v7  ;;  %v391_v60 = vadd.f32 %v390_v56, %v383_v58 }
  0xe6   :  { %v353_v62 = vsel %vm24_vm0, %v352_v24, %v349_v59  ;;  %v394_v63 = vmul.f32 %v391_v60, %v662_v10  ;;  %v402_v0 = vmul.f32 0.999, %v391_v60 }
  0xe7   :  { %v358_v1 = vmul.f32 0.999, %v353_v62  ;;  %v359_v2 = vsub.f32 %v353_v62, %v352_v24 }
  0xe8   :  { %v395_v3 = vsub.f32 %v393_v61, %v394_v63  ;;  %v403_v4 = vadd.f32 %v402_v0, %v659_v7  ;;  %v458_v0 = vmul.f32 0.999, %v445_v52 }
  0xe9   :  { %v360_v6 = vmul.f32 %v359_v2, %v657_v5 }
  0xea   :  { %v396_v8 = vsub.f32 %v395_v3, %v667_v14 }
  0xeb   :  { %v361_v9 = vsub.f32 %v358_v1, %v360_v6 }
  0xec   :  { %v404_v11 = vadd.f32 %v403_v4, %v396_v8 }
  0xed   :  { %v362_v13 = vadd.f32 %v361_v9, %v659_v7 }
  0xee   :  { %v407_v15 = vmul.f32 %v404_v11, %v662_v10  ;;  %v415_v17 = vmul.f32 0.999, %v404_v11 }
  0xef   :  { %v366_v18 = vsel %vm24_vm0, %v365_v35, %v362_v13 }
  0xf0   :  { %v371_v19 = vmul.f32 0.999, %v366_v18  ;;  %v372_v20 = vsub.f32 %v366_v18, %v365_v35  ;;  %v408_v21 = vsub.f32 %v406_v12, %v407_v15  ;;  %v416_v22 = vadd.f32 %v415_v17, %v659_v7 }
  0xf1   :  { %v471_v18 = vmul.f32 0.999, %v458_v0 }
  0xf2   :  { %v373_v23 = vmul.f32 %v372_v20, %v657_v5  ;;  %v409_v24 = vsub.f32 %v408_v21, %v667_v14 }
  0xf4   :  { %v374_v25 = vsub.f32 %v371_v19, %v373_v23  ;;  %v417_v26 = vadd.f32 %v416_v22, %v409_v24 }
  0xf6   :  { %v375_v28 = vadd.f32 %v374_v25, %v659_v7  ;;  %v420_v29 = vmul.f32 %v417_v26, %v662_v10  ;;  %v428_v30 = vmul.f32 0.999, %v417_v26 }
  0xf8   :  { %v379_v31 = vsel %vm24_vm0, %v378_v47, %v375_v28  ;;  %v421_v32 = vsub.f32 %v419_v27, %v420_v29  ;;  %v429_v33 = vadd.f32 %v428_v30, %v659_v7 }
  0xf9   :  { %v384_v34 = vmul.f32 0.999, %v379_v31  ;;  %v385_v35 = vsub.f32 %v379_v31, %v378_v47 }
  0xfa   :  { %v422_v36 = vsub.f32 %v421_v32, %v667_v14 }
  0xfb   :  { %v386_v37 = vmul.f32 %v385_v35, %v657_v5 }
  0xfc   :  { %v430_v38 = vadd.f32 %v429_v33, %v422_v36 }
  0xfd   :  { %v387_v40 = vsub.f32 %v384_v34, %v386_v37  ;;  %v484_v34 = vmul.f32 0.999, %v471_v18 }
  0xfe   :  { %v433_v41 = vmul.f32 %v430_v38, %v662_v10  ;;  %v441_v42 = vmul.f32 0.999, %v430_v38 }
  0xff   :  { %v388_v43 = vadd.f32 %v387_v40, %v659_v7 }
 0x100   :  { %v434_v44 = vsub.f32 %v432_v39, %v433_v41  ;;  %v442_v45 = vadd.f32 %v441_v42, %v659_v7 }
 0x101   :  { %v392_v46 = vsel %vm24_vm0, %v391_v60, %v388_v43 }
 0x102   :  { %v397_v48 = vmul.f32 0.999, %v392_v46  ;;  %v398_v47 = vsub.f32 %v392_v46, %v391_v60  ;;  %v435_v49 = vsub.f32 %v434_v44, %v667_v14 }
 0x104   :  { %v399_v50 = vmul.f32 %v398_v47, %v657_v5  ;;  %v443_v51 = vadd.f32 %v442_v45, %v435_v49 }
 0x106   :  { %v400_v53 = vsub.f32 %v397_v48, %v399_v50  ;;  %v446_v54 = vmul.f32 %v443_v51, %v662_v10  ;;  %v454_v55 = vmul.f32 0.999, %v443_v51 }
 0x108   :  { %v401_v56 = vadd.f32 %v400_v53, %v659_v7  ;;  %v447_v57 = vsub.f32 %v445_v52, %v446_v54  ;;  %v455_v58 = vadd.f32 %v454_v55, %v659_v7  ;;  %v497_v52 = vmul.f32 0.999, %v484_v34 }
 0x10a   :  { %v405_v59 = vsel %vm24_vm0, %v404_v11, %v401_v56  ;;  %v448_v60 = vsub.f32 %v447_v57, %v667_v14 }
 0x10b   :  { %v410_v61 = vmul.f32 0.999, %v405_v59  ;;  %v411_v62 = vsub.f32 %v405_v59, %v404_v11 }
 0x10c   :  { %v456_v63 = vadd.f32 %v455_v58, %v448_v60 }
 0x10d   :  { %v412_v1 = vmul.f32 %v411_v62, %v657_v5 }
 0x10e   :  { %v459_v2 = vmul.f32 %v456_v63, %v662_v10  ;;  %v467_v3 = vmul.f32 0.999, %v456_v63 }
 0x10f   :  { %v413_v4 = vsub.f32 %v410_v61, %v412_v1 }
 0x110   :  { %v460_v6 = vsub.f32 %v458_v0, %v459_v2  ;;  %v468_v8 = vadd.f32 %v467_v3, %v659_v7 }
 0x111   :  { %v414_v9 = vadd.f32 %v413_v4, %v659_v7 }
 0x112   :  { %v461_v12 = vsub.f32 %v460_v6, %v667_v14 }
 0x113   :  { %v418_v13 = vsel %vm24_vm0, %v417_v26, %v414_v9 }
 0x114   :  { %v423_v15 = vmul.f32 0.999, %v418_v13  ;;  %v424_v11 = vsub.f32 %v418_v13, %v417_v26  ;;  %v469_v17 = vadd.f32 %v468_v8, %v461_v12  ;;  %v510_v8 = vmul.f32 0.999, %v497_v52 }
 0x116   :  { %v425_v19 = vmul.f32 %v424_v11, %v657_v5  ;;  %v472_v20 = vmul.f32 %v469_v17, %v662_v10  ;;  %v480_v23 = vmul.f32 0.999, %v469_v17 }
 0x118   :  { %v426_v21 = vsub.f32 %v423_v15, %v425_v19  ;;  %v473_v22 = vsub.f32 %v471_v18, %v472_v20  ;;  %v481_v28 = vadd.f32 %v480_v23, %v659_v7 }
 0x11a   :  { %v427_v24 = vadd.f32 %v426_v21, %v659_v7  ;;  %v474_v27 = vsub.f32 %v473_v22, %v667_v14 }
 0x11c   :  { %v431_v25 = vsel %vm24_vm0, %v430_v38, %v427_v24  ;;  %v482_v31 = vadd.f32 %v481_v28, %v474_v27 }
 0x11d   :  { %v436_v29 = vmul.f32 0.999, %v431_v25  ;;  %v437_v26 = vsub.f32 %v431_v25, %v430_v38 }
 0x11e   :  { %v485_v35 = vmul.f32 %v482_v31, %v662_v10  ;;  %v493_v42 = vmul.f32 0.999, %v482_v31 }
 0x11f   :  { %v438_v30 = vmul.f32 %v437_v26, %v657_v5  ;;  %v523_v26 = vmul.f32 0.999, %v510_v8 }
 0x120   :  { %v486_v41 = vsub.f32 %v484_v34, %v485_v35  ;;  %v494_v45 = vadd.f32 %v493_v42, %v659_v7 }
 0x121   :  { %v439_v32 = vsub.f32 %v436_v29, %v438_v30 }
 0x122   :  { %v487_v44 = vsub.f32 %v486_v41, %v667_v14 }
 0x123   :  { %v440_v33 = vadd.f32 %v439_v32, %v659_v7 }
 0x124   :  { %v495_v49 = vadd.f32 %v494_v45, %v487_v44 }
 0x125   :  { %v444_v36 = vsel %vm24_vm0, %v443_v51, %v440_v33 }
 0x126   :  { %v449_v37 = vmul.f32 0.999, %v444_v36  ;;  %v450_v39 = vsub.f32 %v444_v36, %v443_v51  ;;  %v498_v53 = vmul.f32 %v495_v49, %v662_v10  ;;  %v506_v59 = vmul.f32 0.999, %v495_v49 }
 0x128   :  { %v451_v40 = vmul.f32 %v450_v39, %v657_v5  ;;  %v499_v58 = vsub.f32 %v497_v52, %v498_v53 }
 0x12a   :  { %v452_v43 = vsub.f32 %v449_v37, %v451_v40  ;;  %v500_v62 = vsub.f32 %v499_v58, %v667_v14 }
 0x12c   :  { %v453_v38 = vadd.f32 %v452_v43, %v659_v7 }
 0x12e   :  { %v457_v46 = vsel %vm24_vm0, %v456_v63, %v453_v38 }
 0x12f   :  { %v462_v48 = vmul.f32 0.999, %v457_v46  ;;  %v463_v47 = vsub.f32 %v457_v46, %v456_v63  ;;  %v507_v63 = vadd.f32 %v506_v59, %v659_v7 }
 0x131   :  { %v464_v50 = vmul.f32 %v463_v47, %v657_v5  ;;  %v508_v2 = vadd.f32 %v507_v63, %v500_v62 }
 0x133   :  { %v465_v51 = vsub.f32 %v462_v48, %v464_v50  ;;  %v511_v9 = vmul.f32 %v508_v2, %v662_v10  ;;  %v519_v11 = vmul.f32 0.999, %v508_v2 }
 0x135   :  { %v466_v54 = vadd.f32 %v465_v51, %v659_v7  ;;  %v512_v15 = vsub.f32 %v510_v8, %v511_v9  ;;  %v520_v22 = vadd.f32 %v519_v11, %v659_v7  ;;  %v596_v51 = vld [vmem:[%s974_s0 + $0x8] sm:$0xff] }
 0x137   :  { %v470_v55 = vsel %vm24_vm0, %v469_v17, %v466_v54  ;;  %v513_v21 = vsub.f32 %v512_v15, %v667_v14 }
 0x138   :  { %v475_v56 = vmul.f32 0.999, %v470_v55  ;;  %v476_v57 = vsub.f32 %v470_v55, %v469_v17 }
 0x139   :  { %v521_v25 = vadd.f32 %v520_v22, %v513_v21 }
 0x13a   :  { %v477_v60 = vmul.f32 %v476_v57, %v657_v5  ;;  %v536_v57 = vmul.f32 0.999, %v523_v26 }
 0x13b   :  { %v524_v30 = vmul.f32 %v521_v25, %v662_v10  ;;  %v532_v34 = vmul.f32 0.999, %v521_v25 }
 0x13c   :  { %v478_v61 = vsub.f32 %v475_v56, %v477_v60 }
 0x13d   :  { %v525_v33 = vsub.f32 %v523_v26, %v524_v30  ;;  %v533_v41 = vadd.f32 %v532_v34, %v659_v7 }
 0x13e   :  { %v479_v0 = vadd.f32 %v478_v61, %v659_v7 }
 0x13f   :  { %v526_v37 = vsub.f32 %v525_v33, %v667_v14 }
 0x140   :  { %v483_v1 = vsel %vm24_vm0, %v482_v31, %v479_v0 }
 0x141   :  { %v488_v3 = vmul.f32 0.999, %v483_v1  ;;  %v489_v4 = vsub.f32 %v483_v1, %v482_v31  ;;  %v534_v38 = vadd.f32 %v533_v41, %v526_v37 }
 0x143   :  { %v490_v6 = vmul.f32 %v489_v4, %v657_v5  ;;  %v557_v58 = vmul.f32 %v534_v38, %v662_v10  ;;  %v564_v62 = vmul.f32 0.999, %v534_v38 }
 0x145   :  { %v491_v12 = vsub.f32 %v488_v3, %v490_v6  ;;  %v558_v59 = vsub.f32 %v536_v57, %v557_v58  ;;  %v565_v1 = vadd.f32 %v564_v62, %v659_v7 }
 0x147   :  { %v492_v13 = vadd.f32 %v491_v12, %v659_v7  ;;  %v559_v63 = vsub.f32 %v558_v59, %v667_v14 }
 0x149   :  { %v496_v17 = vsel %vm24_vm0, %v495_v49, %v492_v13  ;;  %v566_v3 = vadd.f32 %v565_v1, %v559_v63 }
 0x14a   :  { %v501_v18 = vmul.f32 0.999, %v496_v17  ;;  %v502_v19 = vsub.f32 %v496_v17, %v495_v49  ;;  %v595_v49 = vld [vmem:[%s974_s0] sm:$0xff] }
 0x14c   :  { %v503_v20 = vmul.f32 %v502_v19, %v657_v5 }
 0x14e   :  { %v504_v23 = vsub.f32 %v501_v18, %v503_v20 }
 0x150   :  { %v505_v24 = vadd.f32 %v504_v23, %v659_v7 }
 0x152   :  { %v509_v27 = vsel %vm24_vm0, %v508_v2, %v505_v24 }
 0x153   :  { %v514_v28 = vmul.f32 0.999, %v509_v27  ;;  %v515_v29 = vsub.f32 %v509_v27, %v508_v2 }
 0x155   :  { %v516_v31 = vmul.f32 %v515_v29, %v657_v5 }
 0x157   :  { %v517_v32 = vsub.f32 %v514_v28, %v516_v31 }
 0x159   :  { %v518_v35 = vadd.f32 %v517_v32, %v659_v7 }
 0x15b   :  { %v522_v36 = vsel %vm24_vm0, %v521_v25, %v518_v35 }
 0x15c   :  { %v527_v39 = vmul.f32 0.999, %v522_v36  ;;  %v528_v40 = vsub.f32 %v522_v36, %v521_v25 }
 0x15e   :  { %v529_v42 = vmul.f32 %v528_v40, %v657_v5 }
 0x160   :  { %v530_v43 = vsub.f32 %v527_v39, %v529_v42 }
 0x162   :  { %v531_v44 = vadd.f32 %v530_v43, %v659_v7 }
 0x164   :  { %v535_v45 = vsel %vm24_vm0, %v534_v38, %v531_v44 }
 0x165   :  { %v537_v46 = vsub.f32 %v535_v45, %v534_v38  ;;  %v542_v47 = vmul.f32 %v535_v45, %v535_v45  ;;  %v560_v60 = vmul.f32 0.999, %v535_v45 }
 0x167   :  { %v538_v48 = vmul.f32 0.5, %v537_v46  ;;  %v543_v53 = vmul.f32 0.05, %v542_v47  ;;  %v561_v61 = vmul.f32 %v537_v46, %v657_v5 }
 0x169   :  { %v539_v50 = vmul.f32 %v595_v49, %v538_v48  ;;  %v562_v0 = vsub.f32 %v560_v60, %v561_v61 }
 0x16b   :  { %v540_v52 = vsub.f32 %v539_v50, %v596_v51  ;;  %v563_v2 = vadd.f32 %v562_v0, %v659_v7 }
 0x16d   :  { %v541_v54 = vmul.f32 %v540_v52, %v537_v46  ;;  %v567_v4 = vsel %vm24_vm0, %v566_v3, %v563_v2 }
 0x16e   :  { %568 = vst.msk [vmem:[%s976_s2] sm:$0xff] %vm545_vm1, %v567_v4 }
 0x16f   :  { %v544_v55 = vadd.f32 %v543_v53, %v541_v54 }
 0x171   :  { %v546_v56 = vsel %vm545_vm1, %v544_v55, 0.0 }
 0x172   :  { %547 = vadd.xlane.f32.xlu0 %v546_v56 }
 0x1ff   :  { %v548_v10 = vpop.xlane.xlu0 %547 }
 0x200   :  { %v549_v6 = vrot.slane %v548_v10, 4 }
 0x202   :  { %v550_v5 = vadd.f32 %v549_v6, %v548_v10 }
 0x204   :  { %v551_v8 = vrot.slane %v550_v5, 2 }
 0x206   :  { %v552_v9 = vadd.f32 %v551_v8, %v550_v5 }
 0x208   :  { %v553_v14 = vrot.slane %v552_v9, 1 }
 0x20a   :  { %v554_v12 = vadd.f32 %v553_v14, %v552_v9 }
 0x20c   :  { %592 = vpush %v554_v12 }
 0x23d   :  { %s593_s28 = spop %592 }
 0x23e   :  { %v556_v7 = vstv %s593_s28 }
 0x23f   :  { %570 = vst.msk [vmem:[#allocation2] sm:$0x1] %vm569_vm2, %v556_v7 }
 0x240   :  { %608 = shalt.err (!%p605_p4)
}
 0x241   :  { %s609_s5 = scalar_lea.hbm %s977_s3, 16 }
 0x242   :  { %p610_p5 = scmp.ne.s32.totalorder %s977_s3, %s609_s5  ;;  %p613_p6 = scmp.lt.u32.totalorder %s609_s5, %s977_s3 }
 0x244   :  { %p615_p7 = pnand %p613_p6, %p610_p5 }
 0x246   :  { %618 = shalt.err (!%p615_p7)
}
 0x247   :  { %582 = dma.vmem_to_hbm [thread:$0]  %s580_s27, 16, %s977_s3, [#allocation3]  }
 0x248   :  { %619 = dma.done.wait [#allocation3], 16  }
 0x249   :  { %620 = vsyncadd [#allocation3], 4294967280 }
 0x24a   :  { %588 = vsyncpa [#allocation3], 1 }

</bundles_post_ra>
